<compile_context>
chip_gen: v5e
topology: v5e:2x2
jax: 0.10.0
libtpu: 0.0.40
codegen_flags: <defaults>
</compile_context>

<pallas_src>
import functools
import math

import jax
import jax.numpy as jnp
import numpy as np
from jax.experimental import pallas as pl
from jax.experimental.pallas import tpu as pltpu

SAMPLE_RATE = 16000
N_FFT = 512
HOP = 260
N_MEL = 64
EPS = 1e-6
N_FREQ = N_FFT // 2 + 1          # 257 rfft bins
F_USED = 256                     # Nyquist bin dropped (its mel weight is exactly 0)
MEL_PAD = 128                    # mel columns padded to a full lane tile


def _round_up(x, m):
    return ((x + m - 1) // m) * m


# ---------------------------------------------------------------------------
# Pallas kernel: windowed DFT (power) + mel projection + log / clip, fully fused
# ---------------------------------------------------------------------------
def _preprocess_kernel(frames_ref, basis_ref, fb_ref, o_ref, *, eps, log_min):
    x = frames_ref[...]                                                     # (TM, 512) bf16
    # Single MXU pass for cos and sin (basis = [cos | sin], window folded in).
    y = jnp.dot(x, basis_ref[...], preferred_element_type=jnp.float32)      # (TM, 512) f32
    re = y[:, :F_USED]
    im = y[:, F_USED:]
    power = re * re + im * im                                               # |X|^2  (power=2)
    mel = jnp.dot(power.astype(jnp.bfloat16), fb_ref[...],
                  preferred_element_type=jnp.float32)                       # (TM, 128) f32
    o_ref[...] = jnp.maximum(jnp.log(mel + eps) - log_min, 0.0)


@functools.lru_cache(maxsize=None)
def _build_call(m_pad, tm):
    kernel = functools.partial(_preprocess_kernel, eps=EPS, log_min=math.log(EPS))
    cost = pl.CostEstimate(
        flops=2 * m_pad * N_FFT * (2 * F_USED) + 2 * m_pad * F_USED * MEL_PAD
              + 3 * m_pad * F_USED,
        transcendentals=m_pad * MEL_PAD,
        bytes_accessed=m_pad * N_FFT * 2 + N_FFT * 2 * F_USED * 2
                       + F_USED * MEL_PAD * 2 + m_pad * MEL_PAD * 4,
    )
    return pl.pallas_call(
        kernel,
        out_shape=jax.ShapeDtypeStruct((m_pad, MEL_PAD), jnp.float32),
        grid=(m_pad // tm,),
        in_specs=[
            pl.BlockSpec((tm, N_FFT), lambda i: (i, 0)),          # frames tile (bf16)
            pl.BlockSpec((N_FFT, 2 * F_USED), lambda i: (0, 0)),  # [cos|sin] basis (bf16)
            pl.BlockSpec((F_USED, MEL_PAD), lambda i: (0, 0)),    # mel filterbank (bf16)
        ],
        out_specs=pl.BlockSpec((tm, MEL_PAD), lambda i: (i, 0)),  # lane-dense output
        compiler_params=pltpu.CompilerParams(dimension_semantics=("parallel",)),
        cost_estimate=cost,
    )


# ---------------------------------------------------------------------------
# Deterministic constant construction (DFT bases with Hann window folded in,
# HTK-style triangular mel filterbank)
# ---------------------------------------------------------------------------
def _hann_periodic(n):
    i = np.arange(n)
    return 0.5 - 0.5 * np.cos(2.0 * np.pi * i / n)


def _dft_basis():
    n = np.arange(N_FFT, dtype=np.float64)[:, None]            # (512, 1)
    f = np.arange(F_USED, dtype=np.float64)[None, :]            # (1, 256)  (Nyquist dropped)
    ang = 2.0 * np.pi * n * f / N_FFT
    w = _hann_periodic(N_FFT)[:, None]
    cos_b = w * np.cos(ang)
    sin_b = w * np.sin(ang)
    basis = np.concatenate([cos_b, sin_b], axis=1).astype(np.float32)  # (512, 512)
    return jnp.asarray(basis, dtype=jnp.bfloat16)


def _hz_to_mel(f):
    return 2595.0 * np.log10(1.0 + f / 700.0)


def _mel_to_hz(m):
    return 700.0 * (10.0 ** (m / 2595.0) - 1.0)


def _mel_filterbank():
    # TODO(synk): HTK-scale triangular filters without Slaney normalization assumed; the exact
    # flavor of the external Spectrogram library backing melSpec may differ slightly.
    # Note: dropping the Nyquist bin (row 256) is exact here because the right edge of the top
    # filter sits at f_max = sr/2 = 8 kHz, so its weight at bin 256 is identically zero.
    f_max = SAMPLE_RATE / 2.0
    mel_pts = np.linspace(_hz_to_mel(0.0), _hz_to_mel(f_max), N_MEL + 2)
    hz_pts = _mel_to_hz(mel_pts)
    bin_freqs = np.arange(F_USED) * SAMPLE_RATE / N_FFT
    fb = np.zeros((F_USED, MEL_PAD), np.float32)
    for m in range(N_MEL):
        left, center, right = hz_pts[m], hz_pts[m + 1], hz_pts[m + 2]
        up = (bin_freqs - left) / max(center - left, 1e-9)
        down = (right - bin_freqs) / max(right - center, 1e-9)
        fb[:, m] = np.maximum(0.0, np.minimum(up, down))
    return jnp.asarray(fb, dtype=jnp.bfloat16)


# ---------------------------------------------------------------------------
# Tiling selection
# ---------------------------------------------------------------------------
def _pick_tiling(m):
    # bf16 frames => sublane tile of 16; keep tiles <= 1024 rows (VMEM-friendly on all gens,
    # incl. v5e's 16 MiB scoped default); aim for >= 2 grid steps so v7x megacore can shard.
    tm = min(1024, max(16, _round_up((m + 1) // 2, 16)))
    m_pad = _round_up(m, tm)
    return m_pad, tm


# ---------------------------------------------------------------------------
# Forward pass
# ---------------------------------------------------------------------------
def preprocess_forward(waveform, basis, fb):
    """waveform: (B, L) float32  ->  (B, 1, N_MEL, T) float32."""
    b, l = waveform.shape
    # TODO(synk): center=True with reflect padding assumed (standard STFT-frontend default);
    # adjust if the original Spectrogram library uses a different padding mode.
    pad = N_FFT // 2
    xp = jnp.pad(waveform, ((0, 0), (pad, pad)), mode="reflect")
    t = 1 + (xp.shape[1] - N_FFT) // HOP
    idx = (np.arange(t) * HOP)[:, None] + np.arange(N_FFT)[None, :]    # static (T, 512)
    frames = xp[:, idx].reshape(b * t, N_FFT)                          # XLA gather glue

    m = b * t
    m_pad, tm = _pick_tiling(m)
    if m_pad != m:
        # zero frames -> mel == 0 -> log(eps) - log(eps) -> clipped to 0 (harmless, sliced off)
        frames = jnp.pad(frames, ((0, m_pad - m), (0, 0)))
    frames = frames.astype(jnp.bfloat16)

    out = _build_call(m_pad, tm)(frames, basis, fb)                    # (m_pad, 128) f32
    out = out[:m, :N_MEL].reshape(b, t, N_MEL)
    return jnp.transpose(out, (0, 2, 1))[:, None, :, :]                # (B, 1, 64, T)


if __name__ == "__main__":
    key = jax.random.PRNGKey(0)
    B, L = 2, SAMPLE_RATE                                  # 2 waveforms of 1 s @ 16 kHz
    waveform = 0.5 * jax.random.normal(key, (B, L), jnp.float32)

    basis = _dft_basis()
    fb = _mel_filterbank()

    fwd = jax.jit(lambda w: preprocess_forward(w, basis, fb))
    out = fwd(waveform)
    jax.block_until_ready(out)

    T = 1 + ((L + 2 * (N_FFT // 2)) - N_FFT) // HOP        # 62 frames
    assert out.shape == (B, 1, N_MEL, T), out.shape
    assert out.dtype == jnp.float32
    assert bool(jnp.all(jnp.isfinite(out))) and bool(jnp.all(out >= 0.0))
    print("KERNEL_OK")
</pallas_src>

<mosaic_0001>
module attributes {stable_mosaic.version = 11 : i64} {
  func.func @_preprocess_kernel(%arg0: i32, %arg1: memref<64x512xbf16, #tpu.memory_space<vmem>>, %arg2: memref<512x512xbf16, #tpu.memory_space<vmem>>, %arg3: memref<256x128xbf16, #tpu.memory_space<vmem>>, %arg4: memref<64x128xf32, #tpu.memory_space<vmem>>) attributes {dimension_semantics = [#tpu.dimension_semantics<parallel>], iteration_bounds = array<i64: 2>, scalar_prefetch = 0 : i64, scratch_operands = 0 : i64, tpu.core_type = #tpu.core_type<tc>, window_params = [{transform_indices = @transform_0, window_bounds = array<i64: 64, 512>}, {pipeline_mode = #tpu.pipeline_mode<synchronous>, transform_indices = @transform_1, window_bounds = array<i64: 512, 512>}, {pipeline_mode = #tpu.pipeline_mode<synchronous>, transform_indices = @transform_2, window_bounds = array<i64: 256, 128>}, {transform_indices = @transform_3, window_bounds = array<i64: 64, 128>}]} {
    %c0 = arith.constant 0 : index
    %c0_0 = arith.constant 0 : index
    %0 = vector.load %arg1[%c0, %c0_0] : memref<64x512xbf16, #tpu.memory_space<vmem>>, vector<64x512xbf16>
    %c0_1 = arith.constant 0 : index
    %c0_2 = arith.constant 0 : index
    %1 = vector.load %arg2[%c0_1, %c0_2] : memref<512x512xbf16, #tpu.memory_space<vmem>>, vector<512x512xbf16>
    %cst = arith.constant dense<0.000000e+00> : vector<64x512xf32>
    %2 = tpu.matmul %0, %1, %cst {dimension_numbers = #tpu.dot_dimension_numbers<[1], [0], [0], [1], [0, 0, 1, 1], [], []>} : vector<64x512xbf16>, vector<512x512xbf16>, vector<64x512xf32> -> vector<64x512xf32>
    %3 = vector.extract_strided_slice %2 {offsets = [0, 0], sizes = [64, 256], strides = [1, 1]} : vector<64x512xf32> to vector<64x256xf32>
    %4 = vector.extract_strided_slice %2 {offsets = [0, 256], sizes = [64, 256], strides = [1, 1]} : vector<64x512xf32> to vector<64x256xf32>
    %5 = arith.mulf %3, %3 : vector<64x256xf32>
    %6 = arith.mulf %4, %4 : vector<64x256xf32>
    %7 = arith.addf %5, %6 : vector<64x256xf32>
    %8 = arith.truncf %7 : vector<64x256xf32> to vector<64x256xbf16>
    %c0_3 = arith.constant 0 : index
    %c0_4 = arith.constant 0 : index
    %9 = vector.load %arg3[%c0_3, %c0_4] : memref<256x128xbf16, #tpu.memory_space<vmem>>, vector<256x128xbf16>
    %cst_5 = arith.constant dense<0.000000e+00> : vector<64x128xf32>
    %10 = tpu.matmul %8, %9, %cst_5 {dimension_numbers = #tpu.dot_dimension_numbers<[1], [0], [0], [1], [0, 0, 1, 1], [], []>} : vector<64x256xbf16>, vector<256x128xbf16>, vector<64x128xf32> -> vector<64x128xf32>
    %cst_6 = arith.constant 9.99999997E-7 : f32
    %11 = vector.broadcast %cst_6 : f32 to vector<64x128xf32>
    %12 = arith.addf %10, %11 : vector<64x128xf32>
    %13 = math.log %12 : vector<64x128xf32>
    %cst_7 = arith.constant -13.8155107 : f32
    %14 = vector.broadcast %cst_7 : f32 to vector<64x128xf32>
    %15 = arith.subf %13, %14 : vector<64x128xf32>
    %cst_8 = arith.constant 0.000000e+00 : f32
    %16 = vector.broadcast %cst_8 : f32 to vector<64x128xf32>
    %17 = arith.maximumf %15, %16 : vector<64x128xf32>
    %c0_9 = arith.constant 0 : index
    %c0_10 = arith.constant 0 : index
    %18 = vector.load %arg4[%c0_9, %c0_10] : memref<64x128xf32, #tpu.memory_space<vmem>>, vector<64x128xf32>
    tpu.vector_store %arg4[%c0_9, %c0_10], %17 {strides = array<i32>} : memref<64x128xf32, #tpu.memory_space<vmem>>, vector<64x128xf32>,
    return
  }
  func.func @transform_0(%arg0: i32) -> (i32, i32) {
    %c0_i32 = arith.constant 0 : i32
    %c0_i32_0 = arith.constant 0 : i32
    return %arg0, %c0_i32 : i32, i32
  }
  func.func @transform_1(%arg0: i32) -> (i32, i32) {
    %c0_i32 = arith.constant 0 : i32
    %c0_i32_0 = arith.constant 0 : i32
    %c0_i32_1 = arith.constant 0 : i32
    return %c0_i32, %c0_i32_0 : i32, i32
  }
  func.func @transform_2(%arg0: i32) -> (i32, i32) {
    %c0_i32 = arith.constant 0 : i32
    %c0_i32_0 = arith.constant 0 : i32
    %c0_i32_1 = arith.constant 0 : i32
    return %c0_i32, %c0_i32_0 : i32, i32
  }
  func.func @transform_3(%arg0: i32) -> (i32, i32) {
    %c0_i32 = arith.constant 0 : i32
    %c0_i32_0 = arith.constant 0 : i32
    return %arg0, %c0_i32 : i32, i32
  }
}

</mosaic_0001>

<bundles_post_ra>
// kernel: _lambda_.1
= control target key start
LH: loop header
LB: loop body
LE: loop exit
PB: predicated region body
PF: predicated region fallthrough
CT: control target
= control target key end

     0   :  { %s2732_s12 = smov 0   ;;  %s3799_s0 = inlined_call_operand.vmem [shape: bf16[128,512], index: 0, kind: input, shape index: {}]   ;;  %s3800_s1 = inlined_call_operand.vmem [shape: bf16[512,512], index: 1, kind: input, shape index: {}]   ;;  %s3801_s2 = inlined_call_operand.vmem [shape: bf16[256,128], index: 2, kind: input, shape index: {}]   ;;  %s3802_s3 = inlined_call_operand.vmem [shape: f32[128,128], index: 3, kind: output, shape index: {}]  }
   0x1 LB: > { %s1843_s13 = sadd.s32 4294967295, %s2710_s12   ;;  %p1847_p0 = scmp.ge.s32.totalorder %s2710_s12, 1  ;;  %s2710_s12 = sphi %s2732_s12, %s13_s12  }
   0x2   : > { %p139_p1 = scmp.lt.s32.totalorder %s2710_s12, 3 }
   0x4   : > { %p140_p2 = pnand %p1847_p0, %p139_p1 }
   0x5   : > { %s1848_s21 = sshll.u32 (!%p140_p2), %s1843_s13, 3 }
   0x6   : > { %143 = sbr.rel (%p140_p2) target bundleno = 617 (0x269), region = 32  ;;  %p165_p3 = scmp.lt.s32.totalorder (!%p140_p2), %s1848_s21, 15 }
   0xb   : > { %v2031_v0 = vld [vmem:[%s3800_s1 + $0xe0] sm:$0xf]  ;;  %v2550_v1 = vld [vmem:[%s3800_s1 + $0xec] sm:$0xf0]  ;;  %s3804_s21 = smov (!%p165_p3, %s1848_s21), 15 }
   0xc   : > { %v2159_v2 = vld [vmem:[%s3800_s1 + $0x1e0] sm:$0xf]  ;;  %v2032_v3 = vor.u32 %v2550_v1, %v2031_v0  ;;  %v2582_v4 = vld [vmem:[%s3800_s1 + $0x1ec] sm:$0xf0]  ;;  %s2503_s20 = sshll.u32 %s3804_s21, 4 }
   0xd   : > { %v2015_v5 = vld [vmem:[%s3800_s1 + $0xc0] sm:$0xf]  ;;  %v2546_v6 = vld [vmem:[%s3800_s1 + $0xcc] sm:$0xf0]  ;;  %v2160_v7 = vor.u32 %v2582_v4, %v2159_v2  ;;  %s2841_s29 = scalar_lea.vmem %s3799_s0, %s2503_s20  ;;  %s1852_s20 = sshll.u32 %s3804_s21, 3 }
   0xe   : > { %v2143_v8 = vld [vmem:[%s3800_s1 + $0x1c0] sm:$0xf]  ;;  %v2578_v9 = vld [vmem:[%s3800_s1 + $0x1cc] sm:$0xf0]  ;;  %2664 = vmatpush.bf16.msra.mxu2 %v2032_v3  ;;  %v2016_v10 = vor.u32 %v2546_v6, %v2015_v5  ;;  %1041 = vmatpush.bf16.msra.mxu0 %v2032_v3  ;;  %v2512_v54 = vld [vmem:[%s2841_s29 + $0x44] sm:$0xf]  ;;  %s3786_s24 = scalar_lea.vmem %s3802_s3, %s1852_s20 }
   0xf   : > { %2672 = vmatpush.bf16.msra.mxu3 %v2160_v7  ;;  %v2144_v11 = vor.u32 %v2578_v9, %v2143_v8  ;;  %v1999_v12 = vld [vmem:[%s3800_s1 + $0xa0] sm:$0xf]  ;;  %v2542_v13 = vld [vmem:[%s3800_s1 + $0xac] sm:$0xf0]  ;;  %1070 = vmatpush.bf16.msra.mxu1 %v2160_v7  ;;  %v1889_v55 = vld [vmem:[%s2841_s29 + $0x50] sm:$0xf0] }
  0x10   : > { %v2127_v14 = vld [vmem:[%s3800_s1 + $0x1a0] sm:$0xf]  ;;  %v2574_v15 = vld [vmem:[%s3800_s1 + $0x1ac] sm:$0xf0]  ;;  %v2000_v16 = vor.u32 %v2542_v13, %v1999_v12  ;;  %v2876_v63 = vor.u32 %v2512_v54, %v1889_v55  ;;  %v2504_v13 = vld [vmem:[%s2841_s29 + $0x4] sm:$0xf] }
  0x11   : > { %v2128_v17 = vor.u32 %v2574_v15, %v2127_v14  ;;  %v1983_v18 = vld [vmem:[%s3800_s1 + $0x80] sm:$0xf]  ;;  %v2538_v19 = vld [vmem:[%s3800_s1 + $0x8c] sm:$0xf0]  ;;  %v1857_v14 = vld [vmem:[%s2841_s29 + $0x10] sm:$0xf0] }
  0x12   : > { %2665 = vmatpush.bf16.msra.mxu2 %v2016_v10  ;;  %1042 = vmatpush.bf16.msra.mxu0 %v2016_v10  ;;  %v2111_v20 = vld [vmem:[%s3800_s1 + $0x180] sm:$0xf]  ;;  %v2570_v21 = vld [vmem:[%s3800_s1 + $0x18c] sm:$0xf0]  ;;  %v1984_v22 = vor.u32 %v2538_v19, %v1983_v18  ;;  %v2289_v54 = vld [vmem:[%s3800_s1 + $0x2f0] sm:$0xf0] }
  0x13   : > { %2673 = vmatpush.bf16.msra.mxu3 %v2144_v11  ;;  %1071 = vmatpush.bf16.msra.mxu1 %v2144_v11  ;;  %v2112_v23 = vor.u32 %v2570_v21, %v2111_v20  ;;  %v1967_v24 = vld [vmem:[%s3800_s1 + $0x60] sm:$0xf]  ;;  %v2534_v25 = vld [vmem:[%s3800_s1 + $0x6c] sm:$0xf0]  ;;  %v2644_v55 = vld [vmem:[%s3800_s1 + $0x3e4] sm:$0xf] }
  0x14   : > { %v2095_v26 = vld [vmem:[%s3800_s1 + $0x160] sm:$0xf]  ;;  %v2566_v27 = vld [vmem:[%s3800_s1 + $0x16c] sm:$0xf0]  ;;  %v1968_v28 = vor.u32 %v2534_v25, %v1967_v24 }
  0x15   : > { %v2096_v29 = vor.u32 %v2566_v27, %v2095_v26  ;;  %v1951_v30 = vld [vmem:[%s3800_s1 + $0x40] sm:$0xf]  ;;  %v2530_v31 = vld [vmem:[%s3800_s1 + $0x4c] sm:$0xf0]  ;;  %v2516_v26 = vld [vmem:[%s2841_s29 + $0x64] sm:$0xf] }
  0x16   : > { %2666 = vmatpush.bf16.msra.mxu2 %v2000_v16  ;;  %1043 = vmatpush.bf16.msra.mxu0 %v2000_v16  ;;  %v2079_v32 = vld [vmem:[%s3800_s1 + $0x140] sm:$0xf]  ;;  %v2562_v33 = vld [vmem:[%s3800_s1 + $0x14c] sm:$0xf0]  ;;  %v1952_v34 = vor.u32 %v2530_v31, %v1951_v30  ;;  %v1905_v27 = vld [vmem:[%s2841_s29 + $0x70] sm:$0xf0] }
  0x17   : > { %2674 = vmatpush.bf16.msra.mxu3 %v2128_v17  ;;  %1072 = vmatpush.bf16.msra.mxu1 %v2128_v17  ;;  %v2080_v35 = vor.u32 %v2562_v33, %v2079_v32  ;;  %v1935_v36 = vld [vmem:[%s3800_s1 + $0x20] sm:$0xf]  ;;  %v2526_v37 = vld [vmem:[%s3800_s1 + $0x2c] sm:$0xf0]  ;;  %v2910_v17 = vor.u32 %v2504_v13, %v1857_v14  ;;  %v2505_v13 = vld [vmem:[%s2841_s29 + $0xc] sm:$0xf] }
  0x18   : > { %v2063_v38 = vld [vmem:[%s3800_s1 + $0x120] sm:$0xf]  ;;  %v2558_v39 = vld [vmem:[%s3800_s1 + $0x12c] sm:$0xf0]  ;;  %v1936_v40 = vor.u32 %v2526_v37, %v1935_v36  ;;  %v1865_v14 = vld [vmem:[%s2841_s29 + $0x18] sm:$0xf0] }
  0x19   : > { %v2064_v41 = vor.u32 %v2558_v39, %v2063_v38  ;;  %v1919_v42 = vld [vmem:[%s3800_s1] sm:$0xf]  ;;  %v2522_v43 = vld [vmem:[%s3800_s1 + $0xc] sm:$0xf0] }
  0x1a   : > { %2667 = vmatpush.bf16.msra.mxu2 %v1984_v22  ;;  %1044 = vmatpush.bf16.msra.mxu0 %v1984_v22  ;;  %v2047_v44 = vld [vmem:[%s3800_s1 + $0x100] sm:$0xf]  ;;  %v2554_v45 = vld [vmem:[%s3800_s1 + $0x10c] sm:$0xf0]  ;;  %v1920_v50 = vor.u32 %v2522_v43, %v1919_v42 }
  0x1b   : > { %2675 = vmatpush.bf16.msra.mxu3 %v2112_v23  ;;  %1073 = vmatpush.bf16.msra.mxu1 %v2112_v23  ;;  %v2287_v46 = vld [vmem:[%s3800_s1 + $0x2e0] sm:$0xf]  ;;  %v2614_v47 = vld [vmem:[%s3800_s1 + $0x2ec] sm:$0xf0]  ;;  %v2048_v53 = vor.u32 %v2554_v45, %v2047_v44 }
  0x1c   : > { %v2415_v48 = vld [vmem:[%s3800_s1 + $0x3e0] sm:$0xf]  ;;  %v2646_v49 = vld [vmem:[%s3800_s1 + $0x3ec] sm:$0xf0]  ;;  %v2288_v56 = vor.u32 %v2614_v47, %v2287_v46 }
  0x1d   : > { %v1887_v51 = vld [vmem:[%s2841_s29 + $0x40] sm:$0xf]  ;;  %v2514_v52 = vld [vmem:[%s2841_s29 + $0x4c] sm:$0xf0]  ;;  %v2416_v57 = vor.u32 %v2646_v49, %v2415_v48 }
  0x1e   : > { %2668 = vmatpush.bf16.msra.mxu2 %v1968_v28  ;;  %1045 = vmatpush.bf16.msra.mxu0 %v1968_v28  ;;  %v2271_v58 = vld [vmem:[%s3800_s1 + $0x2c0] sm:$0xf]  ;;  %v2610_v59 = vld [vmem:[%s3800_s1 + $0x2cc] sm:$0xf0]  ;;  %v2868_v60 = vor.u32 %v2514_v52, %v1887_v51  ;;  %v2508_v52 = vld [vmem:[%s2841_s29 + $0x24] sm:$0xf] }
  0x1f   : > { %2676 = vmatpush.bf16.msra.mxu3 %v2096_v29  ;;  %1074 = vmatpush.bf16.msra.mxu1 %v2096_v29  ;;  %v2399_v61 = vld [vmem:[%s3800_s1 + $0x3c0] sm:$0xf]  ;;  %v2642_v62 = vld [vmem:[%s3800_s1 + $0x3cc] sm:$0xf0]  ;;  %v2272_v0 = vor.u32 %v2610_v59, %v2271_v58  ;;  %v2548_v58 = vld [vmem:[%s3800_s1 + $0xe4] sm:$0xf] }
  0x20   : > { %v2400_v1 = vor.u32 %v2642_v62, %v2399_v61  ;;  %v2255_v2 = vld [vmem:[%s3800_s1 + $0x2a0] sm:$0xf]  ;;  %v2606_v3 = vld [vmem:[%s3800_s1 + $0x2ac] sm:$0xf0]  ;;  %v2033_v59 = vld [vmem:[%s3800_s1 + $0xf0] sm:$0xf0] }
  0x21   : > { %v2383_v4 = vld [vmem:[%s3800_s1 + $0x3a0] sm:$0xf]  ;;  %v2638_v5 = vld [vmem:[%s3800_s1 + $0x3ac] sm:$0xf0]  ;;  %v2256_v6 = vor.u32 %v2606_v3, %v2255_v2  ;;  %v2580_v61 = vld [vmem:[%s3800_s1 + $0x1e4] sm:$0xf] }
  0x22   : > { %2669 = vmatpush.bf16.msra.mxu2 %v1952_v34  ;;  %1046 = vmatpush.bf16.msra.mxu0 %v1952_v34  ;;  %v2239_v7 = vld [vmem:[%s3800_s1 + $0x280] sm:$0xf]  ;;  %v2506_v9 = vld [vmem:[%s2841_s29 + $0xc] sm:$0xf0]  ;;  %v2384_v10 = vor.u32 %v2638_v5, %v2383_v4  ;;  %v1863_v5 = vld [vmem:[%s2841_s29 + $0x8] sm:$0xf] }
  0x23   : > { %2677 = vmatpush.bf16.msra.mxu3 %v2080_v35  ;;  %1075 = vmatpush.bf16.msra.mxu1 %v2080_v35  ;;  %v1855_v8 = vld [vmem:[%s2841_s29] sm:$0xf]  ;;  %v2602_v11 = vld [vmem:[%s3800_s1 + $0x28c] sm:$0xf0]  ;;  %v2944_v35 = vor.u32 %v2516_v26, %v1905_v27  ;;  %v2017_v26 = vld [vmem:[%s3800_s1 + $0xd0] sm:$0xf0] }
  0x24   : > { %v2900_v12 = vor.u32 %v2506_v9, %v1855_v8  ;;  %v2367_v15 = vld [vmem:[%s3800_s1 + $0x380] sm:$0xf]  ;;  %v2634_v16 = vld [vmem:[%s3800_s1 + $0x38c] sm:$0xf0]  ;;  %v2240_v18 = vor.u32 %v2602_v11, %v2239_v7  ;;  %v2608_v7 = vld [vmem:[%s3800_s1 + $0x2c4] sm:$0xf] }
  0x25   : > { %v2368_v19 = vor.u32 %v2634_v16, %v2367_v15  ;;  %v2223_v20 = vld [vmem:[%s3800_s1 + $0x260] sm:$0xf]  ;;  %v2598_v21 = vld [vmem:[%s3800_s1 + $0x26c] sm:$0xf0]  ;;  %v2273_v8 = vld [vmem:[%s3800_s1 + $0x2d0] sm:$0xf0] }
  0x26   : > { %2670 = vmatpush.bf16.msra.mxu2 %v1936_v40  ;;  %1047 = vmatpush.bf16.msra.mxu0 %v1936_v40  ;;  %v2351_v22 = vld [vmem:[%s3800_s1 + $0x360] sm:$0xf]  ;;  %v2630_v23 = vld [vmem:[%s3800_s1 + $0x36c] sm:$0xf0]  ;;  %v2224_v28 = vor.u32 %v2598_v21, %v2223_v20  ;;  %v2507_v9 = vld [vmem:[%s2841_s29 + $0x14] sm:$0xf0]  ;;  %v2276_v15 = vor.u32 %v2608_v7, %v2273_v8  ;;  %v3030_v21 = vor.u32 %v2505_v13, %v1865_v14 }
  0x27   : > { %2678 = vmatpush.bf16.msra.mxu3 %v2064_v41  ;;  %1076 = vmatpush.bf16.msra.mxu1 %v2064_v41  ;;  %v1903_v24 = vld [vmem:[%s2841_s29 + $0x60] sm:$0xf]  ;;  %v2518_v25 = vld [vmem:[%s2841_s29 + $0x6c] sm:$0xf0]  ;;  %v2352_v29 = vor.u32 %v2630_v23, %v2351_v22  ;;  %v2401_v11 = vld [vmem:[%s3800_s1 + $0x3d0] sm:$0xf0]  ;;  %v3022_v16 = vor.u32 %v2507_v9, %v1863_v5 }
  0x28   : > { %v2207_v30 = vld [vmem:[%s3800_s1 + $0x240] sm:$0xf]  ;;  %v2594_v31 = vld [vmem:[%s3800_s1 + $0x24c] sm:$0xf0]  ;;  %v2936_v32 = vor.u32 %v2518_v25, %v1903_v24  ;;  %v2257_v20 = vld [vmem:[%s3800_s1 + $0x2b0] sm:$0xf0] }
  0x29   : > { %v2335_v33 = vld [vmem:[%s3800_s1 + $0x340] sm:$0xf]  ;;  %v2626_v34 = vld [vmem:[%s3800_s1 + $0x34c] sm:$0xf0]  ;;  %v2208_v36 = vor.u32 %v2594_v31, %v2207_v30  ;;  %v2636_v22 = vld [vmem:[%s3800_s1 + $0x3a4] sm:$0xf] }
  0x2a   : > { %2671 = vmatpush.bf16.msra.mxu2 %v1920_v50  ;;  %1048 = vmatpush.bf16.msra.mxu0 %v1920_v50  ;;  %v2336_v37 = vor.u32 %v2626_v34, %v2335_v33  ;;  %v2191_v38 = vld [vmem:[%s3800_s1 + $0x220] sm:$0xf]  ;;  %v2590_v39 = vld [vmem:[%s3800_s1 + $0x22c] sm:$0xf0]  ;;  %v2612_v50 = vld [vmem:[%s3800_s1 + $0x2e4] sm:$0xf] }
  0x2b   : > { %2679 = vmatpush.bf16.msra.mxu3 %v2048_v53  ;;  %1077 = vmatpush.bf16.msra.mxu1 %v2048_v53  ;;  %v2319_v40 = vld [vmem:[%s3800_s1 + $0x320] sm:$0xf]  ;;  %v2622_v41 = vld [vmem:[%s3800_s1 + $0x32c] sm:$0xf0]  ;;  %v2192_v44 = vor.u32 %v2590_v39, %v2191_v38  ;;  %v1873_v53 = vld [vmem:[%s2841_s29 + $0x30] sm:$0xf0]  ;;  %v2292_v3 = vor.u32 %v2612_v50, %v2289_v54 }
  0x2c   : > { %v2175_v42 = vld [vmem:[%s3800_s1 + $0x200] sm:$0xf]  ;;  %v2586_v43 = vld [vmem:[%s3800_s1 + $0x20c] sm:$0xf0]  ;;  %v2320_v49 = vor.u32 %v2622_v41, %v2319_v40  ;;  %v2385_v23 = vld [vmem:[%s3800_s1 + $0x3b0] sm:$0xf0] }
  0x2d   : > { %1059 = vmatmul.bf16.vlgmr.msra.gmra.mxu2 %v2868_v60  ;;  %1049 = vmatmul.bf16.vlgmr.msra.gmra.mxu0 %v2900_v12  ;;  %v2303_v45 = vld [vmem:[%s3800_s1 + $0x300] sm:$0xf]  ;;  %v2618_v46 = vld [vmem:[%s3800_s1 + $0x30c] sm:$0xf0]  ;;  %v2176_v62 = vor.u32 %v2586_v43, %v2175_v42  ;;  %v2544_v25 = vld [vmem:[%s3800_s1 + $0xc4] sm:$0xf] }
  0x2e   : > { %1099 = vmatpush.bf16.msrb.mxu2 %v2288_v56  ;;  %1088 = vmatmul.bf16.vlgmr.msra.gmra.mxu3 %v2876_v63  ;;  %v1871_v47 = vld [vmem:[%s2841_s29 + $0x20] sm:$0xf]  ;;  %v2510_v48 = vld [vmem:[%s2841_s29 + $0x2c] sm:$0xf0]  ;;  %v2417_v56 = vld [vmem:[%s3800_s1 + $0x3f0] sm:$0xf0]  ;;  %v2304_v2 = vor.u32 %v2618_v46, %v2303_v45  ;;  %v2020_v31 = vor.u32 %v2544_v25, %v2017_v26 }
  0x2f   : > { %1128 = vmatpush.bf16.msrb.mxu3 %v2416_v57  ;;  %1078 = vmatmul.bf16.vlgmr.msra.gmra.mxu1 %v2910_v17  ;;  %v2977_v51 = vor.u32 %v2510_v48, %v1871_v47  ;;  %v2990_v57 = vor.u32 %v2508_v52, %v1873_v53  ;;  %v2576_v27 = vld [vmem:[%s3800_s1 + $0x1c4] sm:$0xf]  ;;  %v2241_v30 = vld [vmem:[%s3800_s1 + $0x290] sm:$0xf0]  ;;  %v2511_v5 = vld [vmem:[%s2841_s29 + $0x34] sm:$0xf0] }
  0x30   : > { %v2145_v33 = vld [vmem:[%s3800_s1 + $0x1d0] sm:$0xf0]  ;;  %v2632_v34 = vld [vmem:[%s3800_s1 + $0x384] sm:$0xf]  ;;  %v2509_v8 = vld [vmem:[%s2841_s29 + $0x2c] sm:$0xf] }
  0x31   : > { %v2596_v38 = vld [vmem:[%s3800_s1 + $0x264] sm:$0xf]  ;;  %v2001_v40 = vld [vmem:[%s3800_s1 + $0xb0] sm:$0xf0]  ;;  %v1881_v9 = vld [vmem:[%s2841_s29 + $0x38] sm:$0xf0] }
  0x32   : > { %1100 = vmatpush.bf16.msrb.mxu2 %v2272_v0  ;;  %v2036_v0 = vor.u32 %v2548_v58, %v2033_v59  ;;  %v2540_v39 = vld [vmem:[%s3800_s1 + $0xa4] sm:$0xf]  ;;  %v2225_v42 = vld [vmem:[%s3800_s1 + $0x270] sm:$0xf0] }
  0x33   : > { %1129 = vmatpush.bf16.msrb.mxu3 %v2400_v1  ;;  %v2161_v1 = vld [vmem:[%s3800_s1 + $0x1f0] sm:$0xf0]  ;;  %v2004_v43 = vor.u32 %v2540_v39, %v2001_v40  ;;  %v2628_v47 = vld [vmem:[%s3800_s1 + $0x364] sm:$0xf]  ;;  %v2228_v58 = vor.u32 %v2596_v38, %v2225_v42 }
  0x34   : > { %v2164_v4 = vor.u32 %v2580_v61, %v2161_v1  ;;  %1157 = vmatpush.bf16.msrb.mxu0 %v2036_v0  ;;  %v2129_v45 = vld [vmem:[%s3800_s1 + $0x1b0] sm:$0xf0]  ;;  %v2568_v53 = vld [vmem:[%s3800_s1 + $0x184] sm:$0xf] }
  0x35   : > { %v1985_v50 = vld [vmem:[%s3800_s1 + $0x90] sm:$0xf0]  ;;  %v2592_v59 = vld [vmem:[%s3800_s1 + $0x244] sm:$0xf] }
  0x36   : > { %1101 = vmatpush.bf16.msrb.mxu2 %v2256_v6  ;;  %v2420_v6 = vor.u32 %v2644_v55, %v2417_v56  ;;  %1186 = vmatpush.bf16.msrb.mxu1 %v2164_v4  ;;  %v2353_v52 = vld [vmem:[%s3800_s1 + $0x370] sm:$0xf0]  ;;  %v1879_v56 = vld [vmem:[%s2841_s29 + $0x28] sm:$0xf]  ;;  %v2588_v25 = vld [vmem:[%s3800_s1 + $0x224] sm:$0xf] }
  0x37   : > { %1130 = vmatpush.bf16.msrb.mxu3 %v2384_v10  ;;  %v2640_v10 = vld [vmem:[%s3800_s1 + $0x3c4] sm:$0xf]  ;;  %v2113_v54 = vld [vmem:[%s3800_s1 + $0x190] sm:$0xf0]  ;;  %v2356_v1 = vor.u32 %v2628_v47, %v2353_v52  ;;  %v3128_v14 = vor.u32 %v2511_v5, %v1879_v56  ;;  %v1897_v56 = vld [vmem:[%s2841_s29 + $0x58] sm:$0xf0] }
  0x38   : > { %1158 = vmatpush.bf16.msrb.mxu0 %v2020_v31  ;;  %v2116_v61 = vor.u32 %v2568_v53, %v2113_v54  ;;  %v1969_v0 = vld [vmem:[%s3800_s1 + $0x70] sm:$0xf0]  ;;  %v2524_v31 = vld [vmem:[%s3800_s1 + $0x24] sm:$0xf]  ;;  %v1895_v53 = vld [vmem:[%s2841_s29 + $0x48] sm:$0xf] }
  0x39   : > { %v2097_v4 = vld [vmem:[%s3800_s1 + $0x170] sm:$0xf0]  ;;  %v2584_v39 = vld [vmem:[%s3800_s1 + $0x204] sm:$0xf]  ;;  %v2515_v54 = vld [vmem:[%s2841_s29 + $0x54] sm:$0xf0] }
  0x3a   : > { %1102 = vmatpush.bf16.msrb.mxu2 %v2240_v18  ;;  %v2404_v18 = vor.u32 %v2640_v10, %v2401_v11  ;;  %v2337_v7 = vld [vmem:[%s3800_s1 + $0x350] sm:$0xf0]  ;;  %v2520_v42 = vld [vmem:[%s3800_s1 + $0x4] sm:$0xf] }
  0x3b   : > { %1131 = vmatpush.bf16.msrb.mxu3 %v2368_v19  ;;  %v2604_v19 = vld [vmem:[%s3800_s1 + $0x2a4] sm:$0xf]  ;;  %v2193_v26 = vld [vmem:[%s3800_s1 + $0x230] sm:$0xf0] }
  0x3c   : > { %v2260_v24 = vor.u32 %v2604_v19, %v2257_v20  ;;  %1159 = vmatpush.bf16.msrb.mxu0 %v2004_v43  ;;  %v2528_v19 = vld [vmem:[%s3800_s1 + $0x44] sm:$0xf]  ;;  %v1953_v20 = vld [vmem:[%s3800_s1 + $0x50] sm:$0xf0] }
  0x3d   : > { %1064 = vmatmul.bf16.gmra.mxu2 %v2936_v32  ;;  %1054 = vmatmul.bf16.gmra.mxu0 %v2977_v51  ;;  %v2065_v38 = vld [vmem:[%s3800_s1 + $0x130] sm:$0xf0]  ;;  %v2616_v47 = vld [vmem:[%s3800_s1 + $0x304] sm:$0xf] }
  0x3e   : > { %1103 = vmatpush.bf16.msrb.mxu2 %v2224_v28  ;;  %1093 = vmatmul.bf16.gmra.mxu3 %v2944_v35  ;;  %v2388_v28 = vor.u32 %v2636_v22, %v2385_v23  ;;  %v2560_v22 = vld [vmem:[%s3800_s1 + $0x144] sm:$0xf]  ;;  %v1956_v23 = vor.u32 %v2528_v19, %v1953_v20  ;;  %v1921_v43 = vld [vmem:[%s3800_s1 + $0x10] sm:$0xf0] }
  0x3f   : > { %1132 = vmatpush.bf16.msrb.mxu3 %v2352_v29  ;;  %1083 = vmatmul.bf16.gmra.mxu1 %v2990_v57  ;;  %v2600_v29 = vld [vmem:[%s3800_s1 + $0x284] sm:$0xf] }
  0x40   : > { %v2244_v41 = vor.u32 %v2600_v29, %v2241_v30  ;;  %v2196_v29 = vor.u32 %v2588_v25, %v2193_v26  ;;  %v2321_v30 = vld [vmem:[%s3800_s1 + $0x330] sm:$0xf0]  ;;  %v2579_v26 = vld [vmem:[%s3800_s1 + $0x1d4] sm:$0xf0] }
  0x42   : > { %1104 = vmatpush.bf16.msrb.mxu2 %v2208_v36  ;;  %v2369_v36 = vld [vmem:[%s3800_s1 + $0x390] sm:$0xf0] }
  0x43   : > { %1133 = vmatpush.bf16.msrb.mxu3 %v2336_v37  ;;  %v2148_v37 = vor.u32 %v2576_v27, %v2145_v33  ;;  %v2372_v46 = vor.u32 %v2632_v34, %v2369_v36  ;;  %v1937_v33 = vld [vmem:[%s3800_s1 + $0x30] sm:$0xf0] }
  0x44   : > { %v1940_v36 = vor.u32 %v2524_v31, %v1937_v33  ;;  %v1913_v31 = vld [vmem:[%s2841_s29 + $0x78] sm:$0xf0] }
  0x45   : > { %1187 = vmatpush.bf16.msrb.mxu1 %v2148_v37  ;;  %v2556_v37 = vld [vmem:[%s3800_s1 + $0x124] sm:$0xf] }
  0x46   : > { %1105 = vmatpush.bf16.msrb.mxu2 %v2192_v44  ;;  %v2572_v44 = vld [vmem:[%s3800_s1 + $0x1a4] sm:$0xf]  ;;  %v2068_v40 = vor.u32 %v2556_v37, %v2065_v38  ;;  %v2607_v37 = vld [vmem:[%s3800_s1 + $0x2b4] sm:$0xf0]  ;;  %v2391_v38 = vld [vmem:[%s3800_s1 + $0x3a8] sm:$0xf] }
  0x47   : > { %1134 = vmatpush.bf16.msrb.mxu3 %v2320_v49  ;;  %v2132_v48 = vor.u32 %v2572_v44, %v2129_v45  ;;  %v2536_v49 = vld [vmem:[%s3800_s1 + $0x84] sm:$0xf] }
  0x48   : > { %v1988_v55 = vor.u32 %v2536_v49, %v1985_v50  ;;  %v2552_v45 = vld [vmem:[%s3800_s1 + $0x104] sm:$0xf]  ;;  %v2305_v49 = vld [vmem:[%s3800_s1 + $0x310] sm:$0xf0] }
  0x49   : > { %1188 = vmatpush.bf16.msrb.mxu1 %v2132_v48  ;;  %v1924_v48 = vor.u32 %v2520_v42, %v1921_v43  ;;  %v2308_v52 = vor.u32 %v2616_v47, %v2305_v49  ;;  %v2543_v42 = vld [vmem:[%s3800_s1 + $0xb4] sm:$0xf0]  ;;  %v2247_v47 = vld [vmem:[%s3800_s1 + $0x288] sm:$0xf] }
  0x4a   : > { %1106 = vmatpush.bf16.msrb.mxu2 %v2176_v62  ;;  %v2532_v62 = vld [vmem:[%s3800_s1 + $0x64] sm:$0xf]  ;;  %1160 = vmatpush.bf16.msrb.mxu0 %v1988_v55  ;;  %v2513_v55 = vld [vmem:[%s2841_s29 + $0x4c] sm:$0xf]  ;;  %v2603_v49 = vld [vmem:[%s3800_s1 + $0x294] sm:$0xf0] }
  0x4b   : > { %1135 = vmatpush.bf16.msrb.mxu3 %v2304_v2  ;;  %v2209_v2 = vld [vmem:[%s3800_s1 + $0x250] sm:$0xf0]  ;;  %v1972_v10 = vor.u32 %v2532_v62, %v1969_v0  ;;  %v2615_v62 = vld [vmem:[%s3800_s1 + $0x2f4] sm:$0xf0]  ;;  %v2423_v0 = vld [vmem:[%s3800_s1 + $0x3e8] sm:$0xf] }
  0x4c   : > { %v2212_v11 = vor.u32 %v2592_v59, %v2209_v2  ;;  %v3200_v59 = vor.u32 %v2513_v55, %v1897_v56  ;;  %v2647_v2 = vld [vmem:[%s3800_s1 + $0x3f4] sm:$0xf0]  ;;  %v1991_v55 = vld [vmem:[%s3800_s1 + $0x88] sm:$0xf] }
  0x4d   : > { %1107 = vmatmul.bf16.vlgmr.msrb.gmra.mxu2 %v3022_v16  ;;  %1189 = vmatpush.bf16.msrb.mxu1 %v2116_v61  ;;  %v2295_v61 = vld [vmem:[%s3800_s1 + $0x2e8] sm:$0xf]  ;;  %v2424_v5 = vor.u32 %v2647_v2, %v2423_v0  ;;  %v2539_v56 = vld [vmem:[%s3800_s1 + $0x94] sm:$0xf0] }
  0x4e   : > { %1215 = vmatpush.bf16.msra.mxu2 %v2292_v3  ;;  %1136 = vmatmul.bf16.vlgmr.msrb.gmra.mxu3 %v3030_v21  ;;  %v2564_v3 = vld [vmem:[%s3800_s1 + $0x164] sm:$0xf]  ;;  %v2571_v0 = vld [vmem:[%s3800_s1 + $0x194] sm:$0xf0]  ;;  %v2231_v2 = vld [vmem:[%s3800_s1 + $0x268] sm:$0xf] }
  0x4f   : > { %1244 = vmatpush.bf16.msra.mxu3 %v2420_v6  ;;  %v2624_v6 = vld [vmem:[%s3800_s1 + $0x344] sm:$0xf]  ;;  %v2100_v13 = vor.u32 %v2564_v3, %v2097_v4  ;;  %1161 = vmatpush.bf16.msrb.mxu0 %v1972_v10  ;;  %v2039_v3 = vld [vmem:[%s3800_s1 + $0xe8] sm:$0xf]  ;;  %v2551_v4 = vld [vmem:[%s3800_s1 + $0xf4] sm:$0xf0] }
  0x51   : > { %1190 = vmatpush.bf16.msrb.mxu1 %v2100_v13  ;;  %v2407_v13 = vld [vmem:[%s3800_s1 + $0x3c8] sm:$0xf] }
  0x52   : > { %1216 = vmatpush.bf16.msra.mxu2 %v2276_v15  ;;  %v2340_v15 = vor.u32 %v2624_v6, %v2337_v7  ;;  %v2040_v6 = vor.u32 %v2551_v4, %v2039_v3  ;;  %v2167_v7 = vld [vmem:[%s3800_s1 + $0x1e8] sm:$0xf]  ;;  %v2599_v3 = vld [vmem:[%s3800_s1 + $0x274] sm:$0xf0] }
  0x53   : > { %1245 = vmatpush.bf16.msra.mxu3 %v2404_v18  ;;  %v3130_v18 = vor.u32 %v2509_v8, %v1881_v9  ;;  %1162 = vmatpush.bf16.msrb.mxu0 %v1956_v23  ;;  %v2583_v8 = vld [vmem:[%s3800_s1 + $0x1f4] sm:$0xf0]  ;;  %v2279_v9 = vld [vmem:[%s3800_s1 + $0x2c8] sm:$0xf] }
  0x54   : > { %v2168_v10 = vor.u32 %v2583_v8, %v2167_v7  ;;  %v2547_v23 = vld [vmem:[%s3800_s1 + $0xd4] sm:$0xf0]  ;;  %v2359_v4 = vld [vmem:[%s3800_s1 + $0x368] sm:$0xf] }
  0x55   : > { %v1975_v8 = vld [vmem:[%s3800_s1 + $0x68] sm:$0xf] }
  0x56   : > { %1217 = vmatpush.bf16.msra.mxu2 %v2260_v24  ;;  %v2081_v24 = vld [vmem:[%s3800_s1 + $0x150] sm:$0xf0] }
  0x57   : > { %1246 = vmatpush.bf16.msra.mxu3 %v2388_v28  ;;  %v2084_v27 = vor.u32 %v2560_v22, %v2081_v24  ;;  %v2620_v28 = vld [vmem:[%s3800_s1 + $0x324] sm:$0xf]  ;;  %1163 = vmatpush.bf16.msrb.mxu0 %v1940_v36  ;;  %v2023_v22 = vld [vmem:[%s3800_s1 + $0xc8] sm:$0xf] }
  0x58   : > { %v2324_v34 = vor.u32 %v2620_v28, %v2321_v30  ;;  %v2151_v24 = vld [vmem:[%s3800_s1 + $0x1c8] sm:$0xf]  ;;  %v2024_v25 = vor.u32 %v2547_v23, %v2023_v22  ;;  %v2517_v30 = vld [vmem:[%s2841_s29 + $0x6c] sm:$0xf] }
  0x59   : > { %1191 = vmatpush.bf16.msrb.mxu1 %v2084_v27  ;;  %v2152_v27 = vor.u32 %v2579_v26, %v2151_v24  ;;  %v1911_v28 = vld [vmem:[%s2841_s29 + $0x68] sm:$0xf]  ;;  %v2627_v24 = vld [vmem:[%s3800_s1 + $0x354] sm:$0xf0] }
  0x5a   : > { %1218 = vmatpush.bf16.msra.mxu2 %v2244_v41  ;;  %v2177_v41 = vld [vmem:[%s3800_s1 + $0x210] sm:$0xf0]  ;;  %v2263_v36 = vld [vmem:[%s3800_s1 + $0x2a8] sm:$0xf] }
  0x5b   : > { %1247 = vmatpush.bf16.msra.mxu3 %v2372_v46  ;;  %v2180_v44 = vor.u32 %v2584_v39, %v2177_v41  ;;  %v2049_v46 = vld [vmem:[%s3800_s1 + $0x110] sm:$0xf0]  ;;  %1164 = vmatpush.bf16.msrb.mxu0 %v1924_v48  ;;  %v2264_v39 = vor.u32 %v2607_v37, %v2263_v36  ;;  %v2007_v41 = vld [vmem:[%s3800_s1 + $0xa8] sm:$0xf]  ;;  %v2591_v37 = vld [vmem:[%s3800_s1 + $0x234] sm:$0xf0] }
  0x5c   : > { %v2052_v50 = vor.u32 %v2552_v45, %v2049_v46  ;;  %v2135_v45 = vld [vmem:[%s3800_s1 + $0x1a8] sm:$0xf]  ;;  %v2575_v46 = vld [vmem:[%s3800_s1 + $0x1b4] sm:$0xf0] }
  0x5d   : > { %1112 = vmatmul.bf16.gmra.mxu2 %v3128_v14  ;;  %1192 = vmatpush.bf16.msrb.mxu1 %v2068_v40  ;;  %v2639_v40 = vld [vmem:[%s3800_s1 + $0x3b4] sm:$0xf0]  ;;  %v2136_v48 = vor.u32 %v2575_v46, %v2135_v45  ;;  %v2343_v23 = vld [vmem:[%s3800_s1 + $0x348] sm:$0xf] }
  0x5e   : > { %1219 = vmatpush.bf16.msra.mxu2 %v2228_v58  ;;  %1141 = vmatmul.bf16.gmra.mxu3 %v3130_v18  ;;  %v3198_v58 = vor.u32 %v2515_v54, %v1895_v53  ;;  %v2392_v43 = vor.u32 %v2639_v40, %v2391_v38  ;;  %v2248_v53 = vor.u32 %v2603_v49, %v2247_v47  ;;  %v1959_v26 = vld [vmem:[%s3800_s1 + $0x48] sm:$0xf]  ;;  %v2623_v40 = vld [vmem:[%s3800_s1 + $0x334] sm:$0xf0] }
  0x5f   : > { %1248 = vmatpush.bf16.msra.mxu3 %v2356_v1  ;;  %1165 = vmatmul.bf16.vlgmr.msrb.gmra.mxu0 %v2900_v12  ;;  %v2296_v1 = vor.u32 %v2615_v62, %v2295_v61  ;;  %v2119_v61 = vld [vmem:[%s3800_s1 + $0x188] sm:$0xf]  ;;  %v1992_v62 = vor.u32 %v2539_v56, %v1991_v55  ;;  %v2559_v46 = vld [vmem:[%s3800_s1 + $0x134] sm:$0xf0] }
  0x60   : > { %1273 = vmatpush.bf16.msra.mxu0 %v2040_v6  ;;  %v2631_v6 = vld [vmem:[%s3800_s1 + $0x374] sm:$0xf0]  ;;  %v2199_v36 = vld [vmem:[%s3800_s1 + $0x228] sm:$0xf] }
  0x61   : > { %1193 = vmatpush.bf16.msrb.mxu1 %v2052_v50  ;;  %v2375_v50 = vld [vmem:[%s3800_s1 + $0x388] sm:$0xf]  ;;  %v2360_v7 = vor.u32 %v2631_v6, %v2359_v4  ;;  %v2587_v49 = vld [vmem:[%s3800_s1 + $0x214] sm:$0xf0]  ;;  %v2645_v4 = vld [vmem:[%s3800_s1 + $0x3ec] sm:$0xf] }
  0x62   : > { %1220 = vmatpush.bf16.msra.mxu2 %v2212_v11  ;;  %v2611_v11 = vld [vmem:[%s3800_s1 + $0x2d4] sm:$0xf0]  ;;  %v2327_v38 = vld [vmem:[%s3800_s1 + $0x328] sm:$0xf] }
  0x63   : > { %1249 = vmatpush.bf16.msra.mxu3 %v2340_v15  ;;  %v2643_v15 = vld [vmem:[%s3800_s1 + $0x3d4] sm:$0xf0]  ;;  %v2280_v19 = vor.u32 %v2611_v11, %v2279_v9 }
  0x64   : > { %1194 = vmatmul.bf16.vlgmr.msrb.gmra.mxu1 %v2910_v17  ;;  %v2408_v20 = vor.u32 %v2643_v15, %v2407_v13  ;;  %1274 = vmatpush.bf16.msra.mxu0 %v2024_v25  ;;  %v2535_v9 = vld [vmem:[%s3800_s1 + $0x74] sm:$0xf0]  ;;  %v2215_v15 = vld [vmem:[%s3800_s1 + $0x248] sm:$0xf]  ;;  %v2344_v25 = vor.u32 %v2627_v24, %v2343_v23  ;;  %v2169_v24 = vld [vmem:[%s3800_s1 + $0x1f8] sm:$0xf0] }
  0x65   : > { %1302 = vmatpush.bf16.msra.mxu1 %v2168_v10  ;;  %v2103_v10 = vld [vmem:[%s3800_s1 + $0x168] sm:$0xf]  ;;  %v1976_v11 = vor.u32 %v2535_v9, %v1975_v8  ;;  %v2567_v13 = vld [vmem:[%s3800_s1 + $0x174] sm:$0xf0] }
  0x66   : > { %1221 = vmatpush.bf16.msra.mxu2 %v2196_v29  ;;  %v2519_v29 = vld [vmem:[%s2841_s29 + $0x74] sm:$0xf0] }
  0x67   : > { %1250 = vmatpush.bf16.msra.mxu3 %v2324_v34  ;;  %v3258_v33 = vor.u32 %v2519_v29, %v1911_v28  ;;  %v3260_v34 = vor.u32 %v2517_v30, %v1913_v31  ;;  %v2087_v28 = vld [vmem:[%s3800_s1 + $0x148] sm:$0xf]  ;;  %v2563_v30 = vld [vmem:[%s3800_s1 + $0x154] sm:$0xf0] }
  0x68   : > { %v2088_v31 = vor.u32 %v2563_v30, %v2087_v28  ;;  %v2555_v55 = vld [vmem:[%s3800_s1 + $0x114] sm:$0xf0]  ;;  %v2641_v30 = vld [vmem:[%s3800_s1 + $0x3cc] sm:$0xf] }
  0x69   : > { %1303 = vmatpush.bf16.msra.mxu1 %v2152_v27  ;;  %v2531_v27 = vld [vmem:[%s3800_s1 + $0x54] sm:$0xf0] }
  0x6a   : > { %1222 = vmatpush.bf16.msra.mxu2 %v2180_v44  ;;  %v2008_v44 = vor.u32 %v2543_v42, %v2007_v41  ;;  %v1960_v29 = vor.u32 %v2531_v27, %v1959_v26  ;;  %v2328_v41 = vor.u32 %v2623_v40, %v2327_v38  ;;  %v1943_v42 = vld [vmem:[%s3800_s1 + $0x28] sm:$0xf]  ;;  %v2281_v26 = vld [vmem:[%s3800_s1 + $0x2d8] sm:$0xf0] }
  0x6b   : > { %1251 = vmatpush.bf16.msra.mxu3 %v2308_v52  ;;  %v2635_v52 = vld [vmem:[%s3800_s1 + $0x394] sm:$0xf0] }
  0x6c   : > { %1275 = vmatpush.bf16.msra.mxu0 %v2008_v44  ;;  %v2376_v54 = vor.u32 %v2635_v52, %v2375_v50  ;;  %v2071_v44 = vld [vmem:[%s3800_s1 + $0x128] sm:$0xf] }
  0x6d   : > { %1117 = vmatmul.bf16.gmra.mxu2 %v3198_v58  ;;  %1304 = vmatpush.bf16.msra.mxu1 %v2136_v48  ;;  %v2072_v47 = vor.u32 %v2559_v46, %v2071_v44  ;;  %v2183_v48 = vld [vmem:[%s3800_s1 + $0x208] sm:$0xf]  ;;  %v2605_v46 = vld [vmem:[%s3800_s1 + $0x2ac] sm:$0xf] }
  0x6e   : > { %1146 = vmatmul.bf16.gmra.mxu3 %v3200_v59  ;;  %1331 = vmatpush.bf16.msrb.mxu2 %v2296_v1  ;;  %v2120_v1 = vor.u32 %v2571_v0, %v2119_v61  ;;  %v1927_v50 = vld [vmem:[%s3800_s1 + $0x8] sm:$0xf]  ;;  %v2184_v52 = vor.u32 %v2587_v49, %v2183_v48  ;;  %v2619_v0 = vld [vmem:[%s3800_s1 + $0x314] sm:$0xf0] }
  0x6f   : > { %1360 = vmatpush.bf16.msrb.mxu3 %v2424_v5  ;;  %1170 = vmatmul.bf16.gmra.mxu0 %v2977_v51  ;;  %v2232_v5 = vor.u32 %v2599_v3, %v2231_v2  ;;  %v2613_v2 = vld [vmem:[%s3800_s1 + $0x2ec] sm:$0xf]  ;;  %v2297_v3 = vld [vmem:[%s3800_s1 + $0x2f8] sm:$0xf0] }
  0x70   : > { %1276 = vmatpush.bf16.msra.mxu0 %v1992_v62  ;;  %v2311_v62 = vld [vmem:[%s3800_s1 + $0x308] sm:$0xf] }
  0x71   : > { %1305 = vmatpush.bf16.msra.mxu1 %v2120_v1  ;;  %v2312_v1 = vor.u32 %v2619_v0, %v2311_v62 }
  0x72   : > { %1332 = vmatpush.bf16.msrb.mxu2 %v2280_v19  ;;  %v2595_v19 = vld [vmem:[%s3800_s1 + $0x254] sm:$0xf0] }
  0x73   : > { %1361 = vmatpush.bf16.msrb.mxu3 %v2408_v20  ;;  %v2104_v20 = vor.u32 %v2567_v13, %v2103_v10  ;;  %v2216_v22 = vor.u32 %v2595_v19, %v2215_v15  ;;  %v2549_v19 = vld [vmem:[%s3800_s1 + $0xec] sm:$0xf] }
  0x74   : > { %1199 = vmatmul.bf16.gmra.mxu1 %v2990_v57  ;;  %1277 = vmatpush.bf16.msra.mxu0 %v1976_v11 }
  0x75   : > { %1306 = vmatpush.bf16.msra.mxu1 %v2104_v20  ;;  %v2041_v20 = vld [vmem:[%s3800_s1 + $0xf8] sm:$0xf0] }
  0x76   : > { %1333 = vmatpush.bf16.msrb.mxu2 %v2264_v39  ;;  %v2200_v39 = vor.u32 %v2591_v37, %v2199_v36  ;;  %v2044_v23 = vor.u32 %v2549_v19, %v2041_v20 }
  0x77   : > { %1362 = vmatpush.bf16.msrb.mxu3 %v2392_v43  ;;  %v2527_v43 = vld [vmem:[%s3800_s1 + $0x34] sm:$0xf0] }
  0x78   : > { %1278 = vmatpush.bf16.msra.mxu0 %v1960_v29  ;;  %v1944_v45 = vor.u32 %v2527_v43, %v1943_v42  ;;  %v2025_v42 = vld [vmem:[%s3800_s1 + $0xd8] sm:$0xf0]  ;;  %v2577_v43 = vld [vmem:[%s3800_s1 + $0x1cc] sm:$0xf] }
  0x79   : > { %1307 = vmatpush.bf16.msra.mxu1 %v2088_v31  ;;  %v2409_v31 = vld [vmem:[%s3800_s1 + $0x3d8] sm:$0xf0] }
  0x7a   : > { %1334 = vmatpush.bf16.msrb.mxu2 %v2248_v53  ;;  %v2523_v53 = vld [vmem:[%s3800_s1 + $0x14] sm:$0xf0]  ;;  %v2412_v38 = vor.u32 %v2641_v30, %v2409_v31  ;;  %v2597_v30 = vld [vmem:[%s3800_s1 + $0x26c] sm:$0xf]  ;;  %v2233_v31 = vld [vmem:[%s3800_s1 + $0x278] sm:$0xf0] }
  0x7b   : > { %1363 = vmatpush.bf16.msrb.mxu3 %v2376_v54  ;;  %v2055_v54 = vld [vmem:[%s3800_s1 + $0x108] sm:$0xf]  ;;  %v1928_v56 = vor.u32 %v2523_v53, %v1927_v50  ;;  %v2393_v53 = vld [vmem:[%s3800_s1 + $0x3b8] sm:$0xf0] }
  0x7c   : > { %1279 = vmatpush.bf16.msra.mxu0 %v1944_v45  ;;  %v2056_v61 = vor.u32 %v2555_v55, %v2055_v54  ;;  %v2153_v45 = vld [vmem:[%s3800_s1 + $0x1d8] sm:$0xf0] }
  0x7d   : > { %1122 = vmatmul.bf16.gmra.mxu2 %v3258_v33  ;;  %1308 = vmatpush.bf16.msra.mxu1 %v2072_v47  ;;  %v2265_v47 = vld [vmem:[%s3800_s1 + $0x2b8] sm:$0xf0]  ;;  %v2156_v48 = vor.u32 %v2577_v43, %v2153_v45 }
  0x7e   : > { %1151 = vmatmul.bf16.gmra.mxu3 %v3260_v34  ;;  %1335 = vmatpush.bf16.msrb.mxu2 %v2232_v5  ;;  %v2300_v5 = vor.u32 %v2613_v2, %v2297_v3  ;;  %v2268_v49 = vor.u32 %v2605_v46, %v2265_v47  ;;  %v2009_v2 = vld [vmem:[%s3800_s1 + $0xb8] sm:$0xf0]  ;;  %v2573_v3 = vld [vmem:[%s3800_s1 + $0x1ac] sm:$0xf] }
  0x7f   : > { %1175 = vmatmul.bf16.gmra.mxu0 %v2868_v60  ;;  %1364 = vmatpush.bf16.msrb.mxu3 %v2360_v7  ;;  %v2425_v7 = vld [vmem:[%s3800_s1 + $0x3f8] sm:$0xf0] }
  0x80   : > { %1280 = vmatpush.bf16.msra.mxu0 %v1928_v56  ;;  %v2428_v10 = vor.u32 %v2645_v4, %v2425_v7  ;;  %v2249_v7 = vld [vmem:[%s3800_s1 + $0x298] sm:$0xf0] }
  0x81   : > { %1309 = vmatpush.bf16.msra.mxu1 %v2056_v61 }
  0x82   : > { %1336 = vmatpush.bf16.msrb.mxu2 %v2216_v22  ;;  %v2581_v22 = vld [vmem:[%s3800_s1 + $0x1ec] sm:$0xf] }
  0x83   : > { %1365 = vmatpush.bf16.msrb.mxu3 %v2344_v25  ;;  %v2609_v25 = vld [vmem:[%s3800_s1 + $0x2cc] sm:$0xf]  ;;  %v2172_v27 = vor.u32 %v2581_v22, %v2169_v24 }
  0x84   : > { %1204 = vmatmul.bf16.gmra.mxu1 %v2876_v63  ;;  %v2284_v28 = vor.u32 %v2609_v25, %v2281_v26  ;;  %1389 = vmatpush.bf16.msrb.mxu0 %v2044_v23  ;;  %v2537_v24 = vld [vmem:[%s3800_s1 + $0x8c] sm:$0xf]  ;;  %v1993_v25 = vld [vmem:[%s3800_s1 + $0x98] sm:$0xf0] }
  0x85   : > { %1418 = vmatpush.bf16.msrb.mxu1 %v2172_v27  ;;  %v2569_v26 = vld [vmem:[%s3800_s1 + $0x18c] sm:$0xf]  ;;  %v1996_v27 = vor.u32 %v2537_v24, %v1993_v25  ;;  %v2329_v25 = vld [vmem:[%s3800_s1 + $0x338] sm:$0xf0] }
  0x86   : > { %1337 = vmatpush.bf16.msrb.mxu2 %v2200_v39 }
  0x87   : > { %1366 = vmatpush.bf16.msrb.mxu3 %v2328_v41  ;;  %v2545_v41 = vld [vmem:[%s3800_s1 + $0xcc] sm:$0xf] }
  0x88   : > { %v2028_v44 = vor.u32 %v2545_v41, %v2025_v42  ;;  %v2361_v41 = vld [vmem:[%s3800_s1 + $0x378] sm:$0xf0] }
  0x89   : > { %1419 = vmatpush.bf16.msrb.mxu1 %v2156_v48  ;;  %v2533_v48 = vld [vmem:[%s3800_s1 + $0x6c] sm:$0xf] }
  0x8a   : > { %1338 = vmatpush.bf16.msrb.mxu2 %v2184_v52  ;;  %v2637_v52 = vld [vmem:[%s3800_s1 + $0x3ac] sm:$0xf]  ;;  %1390 = vmatpush.bf16.msrb.mxu0 %v2028_v44 }
  0x8b   : > { %1367 = vmatpush.bf16.msrb.mxu3 %v2312_v1  ;;  %v2396_v56 = vor.u32 %v2637_v52, %v2393_v53  ;;  %v2541_v1 = vld [vmem:[%s3800_s1 + $0xac] sm:$0xf]  ;;  %v2105_v52 = vld [vmem:[%s3800_s1 + $0x178] sm:$0xf0] }
  0x8c   : > { %v2012_v4 = vor.u32 %v2541_v1, %v2009_v2 }
  0x8d   : > { %1223 = vmatmul.bf16.vlgmr.msra.gmra.mxu2 %v3022_v16 }
  0x8e   : > { %1252 = vmatmul.bf16.vlgmr.msra.gmra.mxu3 %v3030_v21  ;;  %1447 = vmatpush.bf16.msra.mxu2 %v2300_v5  ;;  %v2137_v5 = vld [vmem:[%s3800_s1 + $0x1b8] sm:$0xf0] }
  0x8f   : > { %1180 = vmatmul.bf16.gmra.mxu0 %v2936_v32  ;;  %1476 = vmatpush.bf16.msra.mxu3 %v2428_v10  ;;  %v2633_v10 = vld [vmem:[%s3800_s1 + $0x38c] sm:$0xf] }
  0x90   : > { %1391 = vmatpush.bf16.msrb.mxu0 %v2012_v4 }
  0x92   : > { %1448 = vmatpush.bf16.msra.mxu2 %v2284_v28  ;;  %v2121_v28 = vld [vmem:[%s3800_s1 + $0x198] sm:$0xf0] }
  0x93   : > { %1477 = vmatpush.bf16.msra.mxu3 %v2412_v38  ;;  %v2236_v38 = vor.u32 %v2597_v30, %v2233_v31  ;;  %v2525_v30 = vld [vmem:[%s3800_s1 + $0x2c] sm:$0xf]  ;;  %v1945_v31 = vld [vmem:[%s3800_s1 + $0x38] sm:$0xf0] }
  0x94   : > { %1209 = vmatmul.bf16.gmra.mxu1 %v2944_v35  ;;  %1392 = vmatpush.bf16.msrb.mxu0 %v1996_v27 }
  0x96   : > { %1449 = vmatpush.bf16.msra.mxu2 %v2268_v49  ;;  %v1977_v49 = vld [vmem:[%s3800_s1 + $0x78] sm:$0xf0] }
  0x97   : > { %1478 = vmatpush.bf16.msra.mxu3 %v2396_v56  ;;  %v2345_v56 = vld [vmem:[%s3800_s1 + $0x358] sm:$0xf0] }
  0x9d   : > { %1228 = vmatmul.bf16.gmra.mxu2 %v3128_v14 }
  0x9e   : > { %1257 = vmatmul.bf16.gmra.mxu3 %v3130_v18 }
  0x9f   : > { %1281 = vmatmul.bf16.vlgmr.msra.gmra.mxu0 %v2900_v12 }
  0xa4   : > { %1310 = vmatmul.bf16.vlgmr.msra.gmra.mxu1 %v2910_v17 }
  0xaa   : > { %v1050_v6 = vpop.f32.mrf.mxu0 }
  0xac   : > { %v1079_v9 = vpop.f32.mrf.mxu1 }
  0xad   : > { %1233 = vmatmul.bf16.gmra.mxu2 %v3198_v58  ;;  %v3434_v13 = vadd.f32 %v1079_v9, %v1050_v6  ;;  %v2601_v6 = vld [vmem:[%s3800_s1 + $0x28c] sm:$0xf] }
  0xae   : > { %1262 = vmatmul.bf16.gmra.mxu3 %v3200_v59  ;;  %v2252_v9 = vor.u32 %v2601_v6, %v2249_v7  ;;  %v1961_v6 = vld [vmem:[%s3800_s1 + $0x58] sm:$0xf0]  ;;  %v2561_v7 = vld [vmem:[%s3800_s1 + $0x14c] sm:$0xf] }
  0xaf   : > { %1286 = vmatmul.bf16.gmra.mxu0 %v2977_v51 }
  0xb0   : > { %v1060_v8 = vpop.f32.mrf.mxu2  ;;  %1450 = vmatpush.bf16.msra.mxu2 %v2252_v9  ;;  %v2089_v9 = vld [vmem:[%s3800_s1 + $0x158] sm:$0xf0] }
  0xb1   : > { %v1089_v11 = vpop.f32.mrf.mxu3 }
  0xb2   : > { %v3436_v15 = vadd.f32 %v1089_v11, %v1060_v8  ;;  %v3456_v29 = vpop.f32.mrf.mxu0  ;;  %v2140_v8 = vor.u32 %v2573_v3, %v2137_v5  ;;  %v2377_v11 = vld [vmem:[%s3800_s1 + $0x398] sm:$0xf0]  ;;  %v2529_v5 = vld [vmem:[%s3800_s1 + $0x4c] sm:$0xf] }
  0xb3   : > { %v2380_v20 = vor.u32 %v2633_v10, %v2377_v11  ;;  %v2092_v10 = vor.u32 %v2561_v7, %v2089_v9  ;;  %v2589_v11 = vld [vmem:[%s3800_s1 + $0x22c] sm:$0xf] }
  0xb4   : > { %v3464_v37 = vpop.f32.mrf.mxu1  ;;  %1315 = vmatmul.bf16.gmra.mxu1 %v2990_v57  ;;  %1451 = vmatpush.bf16.msra.mxu2 %v2236_v38 }
  0xb5   : > { %1420 = vmatpush.bf16.msrb.mxu1 %v2140_v8  ;;  %1479 = vmatpush.bf16.msra.mxu3 %v2380_v20  ;;  %v1082_v47 = vadd.f32 %v3464_v37, %v3456_v29  ;;  %v2593_v29 = vld [vmem:[%s3800_s1 + $0x24c] sm:$0xf]  ;;  %v2217_v37 = vld [vmem:[%s3800_s1 + $0x258] sm:$0xf0]  ;;  %v1964_v8 = vor.u32 %v2529_v5, %v1961_v6 }
  0xb6   : > { %v2621_v20 = vld [vmem:[%s3800_s1 + $0x32c] sm:$0xf] }
  0xb8   : > { %v1062_v36 = vpop.f32.mrf.mxu2 }
  0xb9   : > { %v1091_v39 = vpop.f32.mrf.mxu3 }
  0xba   : > { %v3466_v40 = vadd.f32 %v1091_v39, %v1062_v36  ;;  %v1055_v50 = vpop.f32.mrf.mxu0  ;;  %v2124_v36 = vor.u32 %v2569_v26, %v2121_v28  ;;  %v2629_v39 = vld [vmem:[%s3800_s1 + $0x36c] sm:$0xf]  ;;  %v2332_v28 = vor.u32 %v2621_v20, %v2329_v25 }
  0xbb   : > { %v2364_v43 = vor.u32 %v2629_v39, %v2361_v41  ;;  %v1948_v41 = vor.u32 %v2525_v30, %v1945_v31 }
  0xbc   : > { %v1084_v55 = vpop.f32.mrf.mxu1  ;;  %1421 = vmatpush.bf16.msrb.mxu1 %v2124_v36  ;;  %v2557_v36 = vld [vmem:[%s3800_s1 + $0x12c] sm:$0xf] }
  0xbd   : > { %1238 = vmatmul.bf16.gmra.mxu2 %v3258_v33  ;;  %v3496_v62 = vadd.f32 %v1084_v55, %v1055_v50  ;;  %1480 = vmatpush.bf16.msra.mxu3 %v2364_v43  ;;  %v1980_v50 = vor.u32 %v2533_v48, %v1977_v49  ;;  %v2625_v55 = vld [vmem:[%s3800_s1 + $0x34c] sm:$0xf] }
  0xbe   : > { %1267 = vmatmul.bf16.gmra.mxu3 %v3260_v34  ;;  %v2348_v1 = vor.u32 %v2625_v55, %v2345_v56  ;;  %v2585_v49 = vld [vmem:[%s3800_s1 + $0x20c] sm:$0xf] }
  0xbf   : > { %1291 = vmatmul.bf16.gmra.mxu0 %v2868_v60 }
  0xc0   : > { %v1065_v54 = vpop.f32.mrf.mxu2  ;;  %1393 = vmatpush.bf16.msrb.mxu0 %v1980_v50 }
  0xc1   : > { %v1094_v61 = vpop.f32.mrf.mxu3  ;;  %1481 = vmatpush.bf16.msra.mxu3 %v2348_v1 }
  0xc2   : > { %v3498_v0 = vadd.f32 %v1094_v61, %v1065_v54  ;;  %v2220_v54 = vor.u32 %v2593_v29, %v2217_v37 }
  0xc4   : > { %1320 = vmatmul.bf16.gmra.mxu1 %v2876_v63  ;;  %1452 = vmatpush.bf16.msra.mxu2 %v2220_v54  ;;  %v1086_v27 = vpop.f32.mrf.mxu1  ;;  %v2313_v54 = vld [vmem:[%s3800_s1 + $0x318] sm:$0xf0] }
  0xc5   : > { %1394 = vmatpush.bf16.msrb.mxu0 %v1964_v8  ;;  %1482 = vmatpush.bf16.msra.mxu3 %v2332_v28 }
  0xc8   : > { %v1067_v19 = vpop.f32.mrf.mxu2 }
  0xc9   : > { %v1096_v22 = vpop.f32.mrf.mxu3  ;;  %1395 = vmatpush.bf16.msrb.mxu0 %v1948_v41 }
  0xca   : > { %v3524_v23 = vadd.f32 %v1096_v22, %v1067_v19  ;;  %v2201_v19 = vld [vmem:[%s3800_s1 + $0x238] sm:$0xf0]  ;;  %v1057_v22 = vpop.f32.mrf.mxu0 }
  0xcb   : > { %v2204_v24 = vor.u32 %v2589_v11, %v2201_v19  ;;  %v1087_v48 = vadd.f32 %v1086_v27, %v1057_v22 }
  0xcd   : > { %1339 = vmatmul.bf16.vlgmr.msrb.gmra.mxu2 %v3022_v16 }
  0xce   : > { %1368 = vmatmul.bf16.vlgmr.msrb.gmra.mxu3 %v3030_v21  ;;  %1453 = vmatpush.bf16.msra.mxu2 %v2204_v24 }
  0xcf   : > { %1296 = vmatmul.bf16.gmra.mxu0 %v2936_v32 }
  0xd0   : > { %v1108_v42 = vpop.f32.mrf.mxu2 }
  0xd1   : > { %v1109_v44 = vadd.f32 %v1108_v42, %v3434_v13  ;;  %v1137_v45 = vpop.f32.mrf.mxu3  ;;  %v2565_v13 = vld [vmem:[%s3800_s1 + $0x16c] sm:$0xf]  ;;  %v2073_v42 = vld [vmem:[%s3800_s1 + $0x138] sm:$0xf0] }
  0xd2   : > { %v2108_v53 = vor.u32 %v2565_v13, %v2105_v52  ;;  %v2076_v43 = vor.u32 %v2557_v36, %v2073_v42  ;;  %v2185_v13 = vld [vmem:[%s3800_s1 + $0x218] sm:$0xf0] }
  0xd3   : > { %v3555_v46 = vadd.f32 %v1137_v45, %v1109_v44  ;;  %v2521_v45 = vld [vmem:[%s3800_s1 + $0xc] sm:$0xf]  ;;  %v2057_v52 = vld [vmem:[%s3800_s1 + $0x118] sm:$0xf0]  ;;  %v2188_v29 = vor.u32 %v2585_v49, %v2185_v13 }
  0xd4   : > { %1422 = vmatpush.bf16.msrb.mxu1 %v2108_v53  ;;  %v2617_v53 = vld [vmem:[%s3800_s1 + $0x30c] sm:$0xf] }
  0xd5   : > { %1325 = vmatmul.bf16.gmra.mxu1 %v2944_v35  ;;  %v2316_v56 = vor.u32 %v2617_v53, %v2313_v54  ;;  %1454 = vmatpush.bf16.msra.mxu2 %v2188_v29 }
  0xd7   : > { %1483 = vmatpush.bf16.msra.mxu3 %v2316_v56 }
  0xd8   : > { %v1110_v61 = vpop.f32.mrf.mxu2  ;;  %1423 = vmatpush.bf16.msrb.mxu1 %v2092_v10 }
  0xd9   : > { %v1111_v2 = vadd.f32 %v1110_v61, %v1082_v47  ;;  %v1139_v3 = vpop.f32.mrf.mxu3  ;;  %v2553_v47 = vld [vmem:[%s3800_s1 + $0x10c] sm:$0xf] }
  0xda   : > { %v2060_v37 = vor.u32 %v2553_v47, %v2057_v52 }
  0xdb   : > { %v3584_v4 = vadd.f32 %v1139_v3, %v1111_v2 }
  0xdc   : > { %1424 = vmatpush.bf16.msrb.mxu1 %v2076_v43  ;;  %v1166_v55 = vpop.f32.mrf.mxu0 }
  0xdd   : > { %1344 = vmatmul.bf16.gmra.mxu2 %v3128_v14 }
  0xde   : > { %1373 = vmatmul.bf16.gmra.mxu3 %v3130_v18 }
  0xe0   : > { %v1113_v26 = vpop.f32.mrf.mxu2  ;;  %1425 = vmatpush.bf16.msrb.mxu1 %v2060_v37 }
  0xe1   : > { %v1114_v38 = vadd.f32 %v1113_v26, %v3496_v62  ;;  %v1142_v39 = vpop.f32.mrf.mxu3  ;;  %v1929_v62 = vld [vmem:[%s3800_s1 + $0x18] sm:$0xf0]  ;;  %v1195_v1 = vpop.f32.mrf.mxu1 }
  0xe2   : > { %v1932_v50 = vor.u32 %v2521_v45, %v1929_v62  ;;  %v1196_v5 = vadd.f32 %v1195_v1, %v1166_v55  ;;  %v2655_v55 = vld [vmem:[%s3801_s2 + $0x38] sm:$0xff] }
  0xe3   : > { %v3626_v44 = vadd.f32 %v1142_v39, %v1114_v38 }
  0xe4   : > { %1396 = vmatpush.bf16.msrb.mxu0 %v1932_v50  ;;  %v1168_v7 = vpop.f32.mrf.mxu0 }
  0xe5   : > { %1426 = vmatmul.bf16.vlgmr.msrb.gmra.mxu1 %v2910_v17 }
  0xe7   : > { %1397 = vmatmul.bf16.vlgmr.msrb.gmra.mxu0 %v2900_v12 }
  0xe8   : > { %v1115_v61 = vpop.f32.mrf.mxu2  ;;  %1689 = vmatpush.bf16.msra.mxu0 %v2655_v55 }
  0xe9   : > { %v1116_v2 = vadd.f32 %v1115_v61, %v1087_v48  ;;  %v1144_v3 = vpop.f32.mrf.mxu3  ;;  %v1197_v9 = vpop.f32.mrf.mxu1 }
  0xeb   : > { %v3653_v6 = vadd.f32 %v1144_v3, %v1116_v2  ;;  %v2653_v2 = vld [vmem:[%s3801_s2 + $0x28] sm:$0xff] }
  0xec   : > { %v1171_v20 = vpop.f32.mrf.mxu0 }
  0xed   : > { %1349 = vmatmul.bf16.gmra.mxu2 %v3198_v58 }
  0xee   : > { %1378 = vmatmul.bf16.gmra.mxu3 %v3200_v59 }
  0xf0   : > { %v1118_v8 = vpop.f32.mrf.mxu2 }
  0xf1   : > { %v1119_v10 = vadd.f32 %v1118_v8, %v3436_v15  ;;  %v1147_v11 = vpop.f32.mrf.mxu3  ;;  %v1200_v24 = vpop.f32.mrf.mxu1 }
  0xf2   : > { %v1201_v26 = vadd.f32 %v1200_v24, %v1171_v20  ;;  %v2651_v20 = vld [vmem:[%s3801_s2 + $0x18] sm:$0xff] }
  0xf3   : > { %v3659_v19 = vadd.f32 %v1147_v11, %v1119_v10 }
  0xf4   : > { %v1173_v15 = vpop.f32.mrf.mxu0 }
  0xf5   : > { %1431 = vmatmul.bf16.gmra.mxu1 %v2990_v57 }
  0xf7   : > { %1402 = vmatmul.bf16.gmra.mxu0 %v2977_v51 }
  0xf8   : > { %v1120_v22 = vpop.f32.mrf.mxu2 }
  0xf9   : > { %v1121_v12 = vadd.f32 %v1120_v22, %v3466_v40  ;;  %v1149_v25 = vpop.f32.mrf.mxu3  ;;  %v1202_v28 = vpop.f32.mrf.mxu1 }
  0xfb   : > { %v3663_v17 = vadd.f32 %v1149_v25, %v1121_v12 }
  0xfc   : > { %v1176_v40 = vpop.f32.mrf.mxu0 }
  0xfd   : > { %1354 = vmatmul.bf16.gmra.mxu2 %v3258_v33 }
  0xfe   : > { %1383 = vmatmul.bf16.gmra.mxu3 %v3260_v34 }
 0x100   : > { %v1123_v27 = vpop.f32.mrf.mxu2 }
 0x101   : > { %v1124_v30 = vadd.f32 %v1123_v27, %v3498_v0  ;;  %v1152_v31 = vpop.f32.mrf.mxu3  ;;  %v1205_v39 = vpop.f32.mrf.mxu1  ;;  %v2649_v27 = vld [vmem:[%s3801_s2 + $0x8] sm:$0xff] }
 0x102   : > { %v1206_v42 = vadd.f32 %v1205_v39, %v1176_v40 }
 0x103   : > { %v3669_v36 = vadd.f32 %v1152_v31, %v1124_v30 }
 0x104   : > { %v1178_v0 = vpop.f32.mrf.mxu0 }
 0x105   : > { %1436 = vmatmul.bf16.gmra.mxu1 %v2876_v63 }
 0x107   : > { %1407 = vmatmul.bf16.gmra.mxu0 %v2868_v60 }
 0x108   : > { %v1125_v38 = vpop.f32.mrf.mxu2 }
 0x109   : > { %v1126_v51 = vadd.f32 %v1125_v38, %v3524_v23  ;;  %v1154_v41 = vpop.f32.mrf.mxu3  ;;  %v1207_v45 = vpop.f32.mrf.mxu1  ;;  %v1198_v23 = vadd.f32 %v1197_v9, %v1168_v7  ;;  %v2652_v7 = vld [vmem:[%s3801_s2 + $0x20] sm:$0xff] }
 0x10b   : > { %v3673_v57 = vadd.f32 %v1154_v41, %v1126_v51 }
 0x10c   : > { %v1181_v49 = vpop.f32.mrf.mxu0 }
 0x10d   : > { %1455 = vmatmul.bf16.vlgmr.msra.gmra.mxu2 %v3022_v16 }
 0x10e   : > { %1484 = vmatmul.bf16.vlgmr.msra.gmra.mxu3 %v3030_v21 }
 0x110   : > { %v1224_v43 = vpop.f32.mrf.mxu2 }
 0x111   : > { %v1225_v62 = vadd.f32 %v1224_v43, %v1196_v5  ;;  %v1253_v47 = vpop.f32.mrf.mxu3  ;;  %v1210_v50 = vpop.f32.mrf.mxu1 }
 0x112   : > { %v1211_v29 = vadd.f32 %v1210_v50, %v1181_v49 }
 0x113   : > { %v3678_v48 = vadd.f32 %v1253_v47, %v1225_v62 }
 0x114   : > { %v1183_v54 = vpop.f32.mrf.mxu0 }
 0x115   : > { %1441 = vmatmul.bf16.gmra.mxu1 %v2944_v35  ;;  %v2654_v35 = vld [vmem:[%s3801_s2 + $0x30] sm:$0xff] }
 0x116   : > { %1690 = vmatpush.bf16.msra.mxu0 %v2654_v35  ;;  %v1505_v35 = vmul.f32 %v3555_v46, %v3555_v46 }
 0x117   : > { %1412 = vmatmul.bf16.gmra.mxu0 %v2936_v32  ;;  %v1203_v32 = vadd.f32 %v1202_v28, %v1173_v15  ;;  %v2648_v28 = vld [vmem:[%s3801_s2] sm:$0xff] }
 0x118   : > { %v1226_v13 = vpop.f32.mrf.mxu2 }
 0x119   : > { %v1227_v60 = vadd.f32 %v1226_v13, %v1198_v23  ;;  %v1255_v52 = vpop.f32.mrf.mxu3  ;;  %v1212_v56 = vpop.f32.mrf.mxu1  ;;  %v2662_v23 = vld [vmem:[%s3801_s2 + $0x70] sm:$0xff] }
 0x11a   : > { %1691 = vmatpush.bf16.msra.mxu0 %v2653_v2  ;;  %v1213_v41 = vadd.f32 %v1212_v56, %v1183_v54 }
 0x11b   : > { %v3681_v63 = vadd.f32 %v1255_v52, %v1227_v60 }
 0x11c   : > { %v1282_v3 = vpop.f32.mrf.mxu0 }
 0x11d   : > { %1460 = vmatmul.bf16.gmra.mxu2 %v3128_v14 }
 0x11e   : > { %1489 = vmatmul.bf16.gmra.mxu3 %v3130_v18  ;;  %1692 = vmatpush.bf16.msra.mxu0 %v2652_v7  ;;  %v2660_v7 = vld [vmem:[%s3801_s2 + $0x60] sm:$0xff] }
 0x120   : > { %v1229_v16 = vpop.f32.mrf.mxu2 }
 0x121   : > { %v1230_v21 = vadd.f32 %v1229_v16, %v1201_v26  ;;  %v1258_v37 = vpop.f32.mrf.mxu3  ;;  %v1311_v5 = vpop.f32.mrf.mxu1 }
 0x122   : > { %1693 = vmatpush.bf16.msra.mxu0 %v2651_v20  ;;  %v1312_v47 = vadd.f32 %v1311_v5, %v1282_v3 }
 0x123   : > { %v3686_v53 = vadd.f32 %v1258_v37, %v1230_v21  ;;  %v2661_v21 = vld [vmem:[%s3801_s2 + $0x68] sm:$0xff] }
 0x124   : > { %v1284_v22 = vpop.f32.mrf.mxu0 }
 0x128   : > { %v1231_v14 = vpop.f32.mrf.mxu2 }
 0x129   : > { %v1232_v61 = vadd.f32 %v1231_v14, %v1203_v32  ;;  %v1260_v18 = vpop.f32.mrf.mxu3  ;;  %v1313_v12 = vpop.f32.mrf.mxu1  ;;  %v1507_v14 = vmul.f32 %v3584_v4, %v3584_v4  ;;  %v2659_v4 = vld [vmem:[%s3801_s2 + $0x58] sm:$0xff] }
 0x12b   : > { %v3694_v1 = vadd.f32 %v1260_v18, %v1232_v61 }
 0x12c   : > { %v1287_v38 = vpop.f32.mrf.mxu0 }
 0x12d   : > { %1465 = vmatmul.bf16.gmra.mxu2 %v3198_v58  ;;  %v1208_v58 = vadd.f32 %v1207_v45, %v1178_v0 }
 0x12e   : > { %1494 = vmatmul.bf16.gmra.mxu3 %v3200_v59  ;;  %v2650_v59 = vld [vmem:[%s3801_s2 + $0x10] sm:$0xff] }
 0x12f   : > { %1694 = vmatpush.bf16.msra.mxu0 %v2650_v59 }
 0x130   : > { %v1234_v8 = vpop.f32.mrf.mxu2 }
 0x131   : > { %v1235_v9 = vadd.f32 %v1234_v8, %v1206_v42  ;;  %v1263_v10 = vpop.f32.mrf.mxu3  ;;  %v1316_v39 = vpop.f32.mrf.mxu1 }
 0x132   : > { %v1317_v2 = vadd.f32 %v1316_v39, %v1287_v38 }
 0x133   : > { %v3704_v11 = vadd.f32 %v1263_v10, %v1235_v9  ;;  %1695 = vmatpush.bf16.msra.mxu0 %v2649_v27 }
 0x134   : > { %v1289_v45 = vpop.f32.mrf.mxu0 }
 0x137   : > { %1696 = vmatpush.bf16.msra.mxu0 %v2648_v28 }
 0x138   : > { %v1236_v24 = vpop.f32.mrf.mxu2 }
 0x139   : > { %v1237_v25 = vadd.f32 %v1236_v24, %v1208_v58  ;;  %v1265_v26 = vpop.f32.mrf.mxu3  ;;  %v1318_v62 = vpop.f32.mrf.mxu1 }
 0x13a   : > { %v1319_v46 = vadd.f32 %v1318_v62, %v1289_v45 }
 0x13b   : > { %v3712_v15 = vadd.f32 %v1265_v26, %v1237_v25 }
 0x13c   : > { %v1292_v60 = vpop.f32.mrf.mxu0 }
 0x13d   : > { %1470 = vmatmul.bf16.gmra.mxu2 %v3258_v33  ;;  %v2663_v33 = vld [vmem:[%s3801_s2 + $0x78] sm:$0xff] }
 0x13e   : > { %1499 = vmatmul.bf16.gmra.mxu3 %v3260_v34  ;;  %1718 = vmatpush.bf16.msra.mxu1 %v2663_v33  ;;  %v2658_v33 = vld [vmem:[%s3801_s2 + $0x50] sm:$0xff] }
 0x140   : > { %v1239_v30 = vpop.f32.mrf.mxu2 }
 0x141   : > { %v1240_v31 = vadd.f32 %v1239_v30, %v1211_v29  ;;  %v1268_v40 = vpop.f32.mrf.mxu3  ;;  %v1321_v52 = vpop.f32.mrf.mxu1  ;;  %v1314_v29 = vadd.f32 %v1313_v12, %v1284_v22  ;;  %v1509_v30 = vmul.f32 %v3626_v44, %v3626_v44 }
 0x142   : > { %1719 = vmatpush.bf16.msra.mxu1 %v2662_v23  ;;  %v1322_v39 = vadd.f32 %v1321_v52, %v1292_v60 }
 0x143   : > { %v3722_v51 = vadd.f32 %v1268_v40, %v1240_v31  ;;  %v1511_v31 = vmul.f32 %v3653_v6, %v3653_v6  ;;  %v2657_v6 = vld [vmem:[%s3801_s2 + $0x48] sm:$0xff] }
 0x144   : > { %v1294_v5 = vpop.f32.mrf.mxu0 }
 0x146   : > { %1720 = vmatpush.bf16.msra.mxu1 %v2661_v21 }
 0x148   : > { %v1241_v42 = vpop.f32.mrf.mxu2 }
 0x149   : > { %v1242_v0 = vadd.f32 %v1241_v42, %v1213_v41  ;;  %v1270_v34 = vpop.f32.mrf.mxu3  ;;  %v1323_v9 = vpop.f32.mrf.mxu1 }
 0x14a   : > { %1721 = vmatpush.bf16.msra.mxu1 %v2660_v7  ;;  %v1324_v44 = vadd.f32 %v1323_v9, %v1294_v5 }
 0x14b   : > { %v3727_v43 = vadd.f32 %v1270_v34, %v1242_v0 }
 0x14c   : > { %v1297_v25 = vpop.f32.mrf.mxu0 }
 0x14e   : > { %1722 = vmatpush.bf16.msra.mxu1 %v2659_v4 }
 0x150   : > { %v1340_v49 = vpop.f32.mrf.mxu2 }
 0x151   : > { %v1369_v13 = vpop.f32.mrf.mxu3  ;;  %v1341_v50 = vadd.f32 %v1340_v49, %v1312_v47 }
 0x152   : > { %v1326_v26 = vpop.f32.mrf.mxu1  ;;  %1723 = vmatpush.bf16.msra.mxu1 %v2658_v33 }
 0x153   : > { %v1370_v16 = vadd.f32 %v1369_v13, %v1341_v50 }
 0x154   : > { %v1299_v62 = vpop.f32.mrf.mxu0 }
 0x155   : > { %v1521_v56 = vmul.f32 %v1370_v16, %v1370_v16  ;;  %v1515_v16 = vmul.f32 %v3663_v17, %v3663_v17 }
 0x156   : > { %1724 = vmatpush.bf16.msra.mxu1 %v2657_v6 }
 0x157   : > { %v1537_v18 = vadd.f32 %v1521_v56, %v1505_v35  ;;  %v1327_v56 = vadd.f32 %v1326_v26, %v1297_v25  ;;  %v2656_v35 = vld [vmem:[%s3801_s2 + $0x40] sm:$0xff] }
 0x158   : > { %v1342_v37 = vpop.f32.mrf.mxu2 }
 0x159   : > { %v1343_v54 = vadd.f32 %v1342_v37, %v1314_v29  ;;  %v1371_v55 = vpop.f32.mrf.mxu3  ;;  %v1513_v29 = vmul.f32 %v3659_v19, %v3659_v19 }
 0x15a   : > { %v1328_v47 = vpop.f32.mrf.mxu1  ;;  %1725 = vmatpush.bf16.msra.mxu1 %v2656_v35 }
 0x15b   : > { %v1372_v32 = vadd.f32 %v1371_v55, %v1343_v54  ;;  %v1329_v19 = vadd.f32 %v1328_v47, %v1299_v62 }
 0x15d   : > { %v1523_v61 = vmul.f32 %v1372_v32, %v1372_v32 }
 0x15f   : > { %v1539_v3 = vadd.f32 %v1523_v61, %v1507_v14 }
 0x160   : > { %v1345_v8 = vpop.f32.mrf.mxu2 }
 0x161   : > { %v1553_v10 = vpack.c.bf16 %v1539_v3, %v1537_v18  ;;  %v1374_v20 = vpop.f32.mrf.mxu3  ;;  %v1346_v58 = vadd.f32 %v1345_v8, %v1317_v2 }
 0x162   : > { %v1427_v54 = vpop.f32.mrf.mxu1 }
 0x163   : > { %1697 = vmatmul.bf16.vlgmr.msra.gmra.mxu0 %v1553_v10  ;;  %v1375_v22 = vadd.f32 %v1374_v20, %v1346_v58  ;;  %v1517_v58 = vmul.f32 %v3669_v36, %v3669_v36 }
 0x164   : > { %v1398_v37 = vpop.f32.mrf.mxu0 }
 0x165   : > { %v1525_v27 = vmul.f32 %v1375_v22, %v1375_v22 }
 0x167   : > { %v1541_v38 = vadd.f32 %v1525_v27, %v1509_v30 }
 0x168   : > { %v1347_v59 = vpop.f32.mrf.mxu2 }
 0x169   : > { %v1348_v24 = vadd.f32 %v1347_v59, %v1319_v46  ;;  %v1376_v12 = vpop.f32.mrf.mxu3  ;;  %v1519_v46 = vmul.f32 %v3673_v57, %v3673_v57  ;;  %v1428_v59 = vadd.f32 %v1427_v54, %v1398_v37 }
 0x16a   : > { %v1429_v7 = vpop.f32.mrf.mxu1 }
 0x16b   : > { %v1377_v28 = vadd.f32 %v1376_v12, %v1348_v24 }
 0x16c   : > { %v1400_v5 = vpop.f32.mrf.mxu0 }
 0x16d   : > { %v1527_v40 = vmul.f32 %v1377_v28, %v1377_v28 }
 0x16f   : > { %v1543_v41 = vadd.f32 %v1527_v40, %v1511_v31  ;;  %v1430_v31 = vadd.f32 %v1429_v7, %v1400_v5 }
 0x170   : > { %v1350_v42 = vpop.f32.mrf.mxu2 }
 0x171   : > { %v1379_v0 = vpop.f32.mrf.mxu3  ;;  %v1555_v34 = vpack.c.bf16 %v1543_v41, %v1541_v38  ;;  %v1351_v45 = vadd.f32 %v1350_v42, %v1322_v39 }
 0x172   : > { %v1432_v28 = vpop.f32.mrf.mxu1 }
 0x173   : > { %1702 = vmatmul.bf16.gmra.mxu0 %v1555_v34  ;;  %v1380_v23 = vadd.f32 %v1379_v0, %v1351_v45  ;;  %v1506_v0 = vmul.f32 %v3678_v48, %v3678_v48  ;;  %v1508_v34 = vmul.f32 %v3681_v63, %v3681_v63  ;;  %v1510_v63 = vmul.f32 %v3686_v53, %v3686_v53 }
 0x174   : > { %v1403_v27 = vpop.f32.mrf.mxu0 }
 0x175   : > { %v1529_v60 = vmul.f32 %v1380_v23, %v1380_v23  ;;  %v1433_v47 = vadd.f32 %v1432_v28, %v1403_v27 }
 0x177   : > { %v1545_v55 = vadd.f32 %v1529_v60, %v1513_v29 }
 0x178   : > { %v1352_v49 = vpop.f32.mrf.mxu2 }
 0x179   : > { %v1353_v13 = vadd.f32 %v1352_v49, %v1324_v44  ;;  %v1381_v50 = vpop.f32.mrf.mxu3 }
 0x17a   : > { %v1434_v57 = vpop.f32.mrf.mxu1 }
 0x17b   : > { %v1382_v52 = vadd.f32 %v1381_v50, %v1353_v13 }
 0x17c   : > { %v1405_v42 = vpop.f32.mrf.mxu0 }
 0x17d   : > { %v1531_v21 = vmul.f32 %v1382_v52, %v1382_v52  ;;  %v1435_v52 = vadd.f32 %v1434_v57, %v1405_v42  ;;  %v1520_v42 = vmul.f32 %v3727_v43, %v3727_v43 }
 0x17f   : > { %v1547_v32 = vadd.f32 %v1531_v21, %v1515_v16 }
 0x180   : > { %v1355_v14 = vpop.f32.mrf.mxu2 }
 0x181   : > { %v1384_v61 = vpop.f32.mrf.mxu3  ;;  %v1557_v18 = vpack.c.bf16 %v1547_v32, %v1545_v55  ;;  %v1356_v2 = vadd.f32 %v1355_v14, %v1327_v56  ;;  %v1512_v55 = vmul.f32 %v3694_v1, %v3694_v1 }
 0x182   : > { %v1437_v60 = vpop.f32.mrf.mxu1 }
 0x183   : > { %1707 = vmatmul.bf16.gmra.mxu0 %v1557_v18  ;;  %v1385_v3 = vadd.f32 %v1384_v61, %v1356_v2 }
 0x184   : > { %v1408_v50 = vpop.f32.mrf.mxu0 }
 0x185   : > { %v1533_v10 = vmul.f32 %v1385_v3, %v1385_v3  ;;  %v1438_v35 = vadd.f32 %v1437_v60, %v1408_v50 }
 0x187   : > { %v1549_v4 = vadd.f32 %v1533_v10, %v1517_v58 }
 0x188   : > { %v1357_v17 = vpop.f32.mrf.mxu2 }
 0x189   : > { %v1358_v8 = vadd.f32 %v1357_v17, %v1329_v19  ;;  %v1386_v9 = vpop.f32.mrf.mxu3 }
 0x18a   : > { %v1439_v18 = vpop.f32.mrf.mxu1 }
 0x18b   : > { %v1387_v20 = vadd.f32 %v1386_v9, %v1358_v8 }
 0x18c   : > { %v1410_v61 = vpop.f32.mrf.mxu0 }
 0x18d   : > { %v1535_v22 = vmul.f32 %v1387_v20, %v1387_v20  ;;  %v1440_v17 = vadd.f32 %v1439_v18, %v1410_v61 }
 0x18f   : > { %v1551_v24 = vadd.f32 %v1535_v22, %v1519_v46  ;;  %v1514_v46 = vmul.f32 %v3704_v11, %v3704_v11  ;;  %v1516_v22 = vmul.f32 %v3712_v15, %v3712_v15  ;;  %v1518_v15 = vmul.f32 %v3722_v51, %v3722_v51 }
 0x190   : > { %v1456_v12 = vpop.f32.mrf.mxu2 }
 0x191   : > { %v1485_v25 = vpop.f32.mrf.mxu3  ;;  %v1559_v26 = vpack.c.bf16 %v1551_v24, %v1549_v4  ;;  %v1457_v30 = vadd.f32 %v1456_v12, %v1428_v59 }
 0x192   : > { %v1442_v20 = vpop.f32.mrf.mxu1 }
 0x193   : > { %1712 = vmatmul.bf16.gmra.mxu0 %v1559_v26  ;;  %v1486_v40 = vadd.f32 %v1485_v25, %v1457_v30 }
 0x194   : > { %v1413_v53 = vpop.f32.mrf.mxu0 }
 0x195   : > { %v1522_v36 = vmul.f32 %v1486_v40, %v1486_v40  ;;  %v1443_v24 = vadd.f32 %v1442_v20, %v1413_v53 }
 0x197   : > { %v1538_v62 = vadd.f32 %v1522_v36, %v1506_v0 }
 0x198   : > { %v1458_v38 = vpop.f32.mrf.mxu2 }
 0x199   : > { %v1459_v39 = vadd.f32 %v1458_v38, %v1430_v31  ;;  %v1487_v41 = vpop.f32.mrf.mxu3 }
 0x19a   : > { %v1444_v31 = vpop.f32.mrf.mxu1 }
 0x19b   : > { %v1488_v33 = vadd.f32 %v1487_v41, %v1459_v39 }
 0x19c   : > { %v1415_v30 = vpop.f32.mrf.mxu0 }
 0x19d   : > { %v1524_v45 = vmul.f32 %v1488_v33, %v1488_v33  ;;  %v1445_v40 = vadd.f32 %v1444_v31, %v1415_v30 }
 0x19f   : > { %v1540_v44 = vadd.f32 %v1524_v45, %v1508_v34 }
 0x1a0   : > { %v1461_v23 = vpop.f32.mrf.mxu2 }
 0x1a1   : > { %v1554_v6 = vpack.c.bf16 %v1540_v44, %v1538_v62  ;;  %v1490_v49 = vpop.f32.mrf.mxu3  ;;  %v1462_v13 = vadd.f32 %v1461_v23, %v1433_v47 }
 0x1a3   : > { %1726 = vmatmul.bf16.vlgmr.msra.gmra.mxu1 %v1554_v6  ;;  %v1491_v29 = vadd.f32 %v1490_v49, %v1462_v13 }
 0x1a5   : > { %v1526_v48 = vmul.f32 %v1491_v29, %v1491_v29 }
 0x1a7   : > { %v1542_v32 = vadd.f32 %v1526_v48, %v1510_v63 }
 0x1a8   : > { %v1463_v16 = vpop.f32.mrf.mxu2 }
 0x1a9   : > { %v1464_v21 = vadd.f32 %v1463_v16, %v1435_v52  ;;  %v1492_v37 = vpop.f32.mrf.mxu3 }
 0x1ab   : > { %v1493_v54 = vadd.f32 %v1492_v37, %v1464_v21 }
 0x1ad   : > { %v1528_v56 = vmul.f32 %v1493_v54, %v1493_v54 }
 0x1af   : > { %v1544_v14 = vadd.f32 %v1528_v56, %v1512_v55 }
 0x1b0   : > { %v1466_v2 = vpop.f32.mrf.mxu2 }
 0x1b1   : > { %v1495_v19 = vpop.f32.mrf.mxu3  ;;  %v1556_v3 = vpack.c.bf16 %v1544_v14, %v1542_v32  ;;  %v1467_v5 = vadd.f32 %v1466_v2, %v1438_v35 }
 0x1b3   : > { %1731 = vmatmul.bf16.gmra.mxu1 %v1556_v3  ;;  %v1496_v7 = vadd.f32 %v1495_v19, %v1467_v5 }
 0x1b5   : > { %v1530_v58 = vmul.f32 %v1496_v7, %v1496_v7 }
 0x1b7   : > { %v1546_v59 = vadd.f32 %v1530_v58, %v1514_v46 }
 0x1b8   : > { %v1468_v8 = vpop.f32.mrf.mxu2 }
 0x1b9   : > { %v1469_v9 = vadd.f32 %v1468_v8, %v1440_v17  ;;  %v1497_v10 = vpop.f32.mrf.mxu3 }
 0x1bb   : > { %v1498_v1 = vadd.f32 %v1497_v10, %v1469_v9 }
 0x1bd   : > { %v1532_v4 = vmul.f32 %v1498_v1, %v1498_v1 }
 0x1bf   : > { %v1548_v12 = vadd.f32 %v1532_v4, %v1516_v22 }
 0x1c0   : > { %v1471_v25 = vpop.f32.mrf.mxu2 }
 0x1c1   : > { %v1500_v26 = vpop.f32.mrf.mxu3  ;;  %v1558_v27 = vpack.c.bf16 %v1548_v12, %v1546_v59  ;;  %v1472_v28 = vadd.f32 %v1471_v25, %v1443_v24 }
 0x1c3   : > { %1736 = vmatmul.bf16.gmra.mxu1 %v1558_v27  ;;  %v1501_v38 = vadd.f32 %v1500_v26, %v1472_v28 }
 0x1c5   : > { %v1534_v11 = vmul.f32 %v1501_v38, %v1501_v38 }
 0x1c7   : > { %v1550_v0 = vadd.f32 %v1534_v11, %v1518_v15 }
 0x1c8   : > { %v1473_v39 = vpop.f32.mrf.mxu2 }
 0x1c9   : > { %v1474_v41 = vadd.f32 %v1473_v39, %v1445_v40  ;;  %v1502_v36 = vpop.f32.mrf.mxu3 }
 0x1cb   : > { %v1503_v33 = vadd.f32 %v1502_v36, %v1474_v41 }
 0x1cd   : > { %v1536_v57 = vmul.f32 %v1503_v33, %v1503_v33 }
 0x1cf   : > { %v1552_v34 = vadd.f32 %v1536_v57, %v1520_v42 }
 0x1d1   : > { %v1560_v45 = vpack.c.bf16 %v1552_v34, %v1550_v0 }
 0x1d3   : > { %1741 = vmatmul.bf16.gmra.mxu1 %v1560_v45 }
 0x1e0   : > { %v1698_v62 = vpop.f32.mrf.mxu0 }
 0x1e1   : > { %v1699_v44 = vadd.f32 1e-06, %v1698_v62 }
 0x1e8   : > { %v1700_v47 = vpop.f32.mrf.mxu0 }
 0x1e9   : > { %v1701_v13 = vadd.f32 1e-06, %v1700_v47 }
 0x1f0   : > { %v1703_v49 = vpop.f32.mrf.mxu0 }
 0x1f1   : > { %v1704_v21 = vadd.f32 1e-06, %v1703_v49 }
 0x1f8   : > { %v1705_v43 = vpop.f32.mrf.mxu0 }
 0x1f9   : > { %v1706_v35 = vadd.f32 1e-06, %v1705_v43 }
 0x200   : > { %v1708_v56 = vpop.f32.mrf.mxu0 }
 0x201   : > { %v1709_v5 = vadd.f32 1e-06, %v1708_v56 }
 0x208   : > { %v1710_v17 = vpop.f32.mrf.mxu0 }
 0x209   : > { %v1711_v58 = vadd.f32 1e-06, %v1710_v17 }
 0x210   : > { %v1713_v4 = vpop.f32.mrf.mxu0 }
 0x211   : > { %v1714_v25 = vadd.f32 1e-06, %v1713_v4 }
 0x218   : > { %v1715_v31 = vpop.f32.mrf.mxu0 }
 0x219   : > { %v1716_v39 = vadd.f32 1e-06, %v1715_v31 }
 0x220   : > { %v1727_v23 = vpop.f32.mrf.mxu1 }
 0x221   : > { %v1728_v6 = vadd.f32 %v1727_v23, %v1699_v44 }
 0x223   : > { %2688 = vlog2.f32 %v1728_v6 }
 0x228   : > { %v1729_v50 = vpop.f32.mrf.mxu1 }
 0x229   : > { %v2689_v60 = vpop.eup %2688  ;;  %v1730_v51 = vadd.f32 %v1729_v50, %v1701_v13 }
 0x22a   : > { %v1748_v52 = vmul.f32 0.6931472, %v2689_v60 }
 0x22b   : > { %2690 = vlog2.f32 %v1730_v51 }
 0x22c   : > { %v2493_v29 = vadd.f32 13.815511, %v1748_v52 }
 0x22e   : > { %v1771_v16 = vmax.f32 %v2493_v29, 0.0 }
 0x230   : > { %1779 = vst [vmem:[%s3786_s24] sm:$0xff] %v1771_v16  ;;  %v1732_v37 = vpop.f32.mrf.mxu1 }
 0x231   : > { %v2691_v48 = vpop.eup %2690  ;;  %v1733_v54 = vadd.f32 %v1732_v37, %v1704_v21 }
 0x232   : > { %v1750_v63 = vmul.f32 0.6931472, %v2691_v48 }
 0x233   : > { %2692 = vlog2.f32 %v1733_v54 }
 0x234   : > { %v2494_v55 = vadd.f32 13.815511, %v1750_v63 }
 0x236   : > { %v1772_v32 = vmax.f32 %v2494_v55, 0.0 }
 0x238   : > { %1780 = vst [vmem:[%s3786_s24 + $0x8] sm:$0xff] %v1772_v32  ;;  %v1734_v14 = vpop.f32.mrf.mxu1 }
 0x239   : > { %v2693_v61 = vpop.eup %2692  ;;  %v1735_v18 = vadd.f32 %v1734_v14, %v1706_v35 }
 0x23a   : > { %v1752_v2 = vmul.f32 0.6931472, %v2693_v61 }
 0x23b   : > { %2694 = vlog2.f32 %v1735_v18 }
 0x23c   : > { %v2495_v19 = vadd.f32 13.815511, %v1752_v2 }
 0x23e   : > { %v1773_v3 = vmax.f32 %v2495_v19, 0.0 }
 0x240   : > { %1781 = vst [vmem:[%s3786_s24 + $0x10] sm:$0xff] %v1773_v3  ;;  %v1737_v7 = vpop.f32.mrf.mxu1 }
 0x241   : > { %v2695_v8 = vpop.eup %2694  ;;  %v1738_v9 = vadd.f32 %v1737_v7, %v1709_v5 }
 0x242   : > { %v1754_v10 = vmul.f32 0.6931472, %v2695_v8 }
 0x243   : > { %2696 = vlog2.f32 %v1738_v9 }
 0x244   : > { %v2496_v53 = vadd.f32 13.815511, %v1754_v10 }
 0x246   : > { %v1774_v20 = vmax.f32 %v2496_v53, 0.0 }
 0x248   : > { %1782 = vst [vmem:[%s3786_s24 + $0x18] sm:$0xff] %v1774_v20  ;;  %v1739_v1 = vpop.f32.mrf.mxu1 }
 0x249   : > { %v2697_v46 = vpop.eup %2696  ;;  %v1740_v22 = vadd.f32 %v1739_v1, %v1711_v58 }
 0x24a   : > { %v1756_v59 = vmul.f32 0.6931472, %v2697_v46 }
 0x24b   : > { %2698 = vlog2.f32 %v1740_v22 }
 0x24c   : > { %v2497_v24 = vadd.f32 13.815511, %v1756_v59 }
 0x24e   : > { %v1775_v12 = vmax.f32 %v2497_v24, 0.0 }
 0x250   : > { %1783 = vst [vmem:[%s3786_s24 + $0x20] sm:$0xff] %v1775_v12  ;;  %v1742_v26 = vpop.f32.mrf.mxu1 }
 0x251   : > { %v2699_v27 = vpop.eup %2698  ;;  %v1743_v28 = vadd.f32 %v1742_v26, %v1714_v25 }
 0x252   : > { %v1758_v30 = vmul.f32 0.6931472, %v2699_v27 }
 0x253   : > { %2700 = vlog2.f32 %v1743_v28 }
 0x254   : > { %v2498_v40 = vadd.f32 13.815511, %v1758_v30 }
 0x256   : > { %v1776_v38 = vmax.f32 %v2498_v40, 0.0 }
 0x258   : > { %1784 = vst [vmem:[%s3786_s24 + $0x28] sm:$0xff] %v1776_v38  ;;  %v1744_v41 = vpop.f32.mrf.mxu1 }
 0x259   : > { %v2701_v36 = vpop.eup %2700  ;;  %v1745_v11 = vadd.f32 %v1744_v41, %v1716_v39 }
 0x25a   : > { %v1760_v33 = vmul.f32 0.6931472, %v2701_v36 }
 0x25b   : > { %2702 = vlog2.f32 %v1745_v11 }
 0x25c   : > { %v2499_v15 = vadd.f32 13.815511, %v1760_v33 }
 0x25e   : > { %v1777_v42 = vmax.f32 %v2499_v15, 0.0 }
 0x260   : > { %1785 = vst [vmem:[%s3786_s24 + $0x30] sm:$0xff] %v1777_v42 }
 0x261   : > { %v2703_v57 = vpop.eup %2702 }
 0x262   : > { %v1762_v0 = vmul.f32 0.6931472, %v2703_v57 }
 0x264   : > { %v2500_v34 = vadd.f32 13.815511, %v1762_v0 }
 0x266   : > { %v1778_v45 = vmax.f32 %v2500_v34, 0.0 }
 0x268   : > { %1786 = vst [vmem:[%s3786_s24 + $0x38] sm:$0xff] %v1778_v45 }
 0x269 PF: > { %s13_s12 = sadd.s32 1, %s2710_s12  }
 0x26a   : > { %p10_p4 = scmp.ge.s32.totalorder %s13_s12, 4  }
 0x26c   :  { %12 = sbr.rel (!%p10_p4) target bundleno = 1 (0x1), region = 62 }

</bundles_post_ra>
